<compile_context>
chip_gen: v5e
topology: v5e:2x2
jax: 0.10.0
libtpu: 0.0.40
codegen_flags: <defaults>
</compile_context>

<pallas_src>
import functools
import math

import jax
import jax.numpy as jnp
from jax.experimental import pallas as pl
from jax.experimental.pallas import tpu as pltpu


def _cdiv(a, b):
    return -(-a // b)


def _lcm(a, b):
    return a * b // math.gcd(a, b)


def _round_up(a, b):
    return _cdiv(a, b) * b


def _patch_tokens_kernel(x_ref, o_ref, *, cg, s_tile, patch, total_t, mask_tail):
    # x_ref: (cg, s_tile*patch) time-contiguous slice of one batch element
    # o_ref: (s_tile, cg*patch) lane-dense token tile
    lanes = s_tile * patch
    x = x_ref[...]                                              # (cg, s_tile*P)
    if mask_tail:
        # Zero-fill the ragged tail: data past T in the last (partial) input
        # block is unspecified, and the reference pads those samples with 0.
        si = pl.program_id(2)
        t = si * lanes + jax.lax.broadcasted_iota(jnp.int32, x.shape, 1)
        x = jnp.where(t < total_t, x, jnp.zeros_like(x))
    # Small per-tile repack; the (batch, channel-group, patch-tile) placement is
    # handled entirely by the BlockSpec index maps.
    x = x.reshape(cg, s_tile, patch)
    x = jnp.transpose(x, (1, 0, 2))                             # (s_tile, cg, P)
    o_ref[...] = x.reshape(s_tile, cg * patch)                  # lane-dense store


def _auto_channel_group(C, patch):
    """Channel-group size: lane-dense (cg*P % 128 == 0) and sublane-legal
    (cg % 8 == 0); falls back to the always-legal full-C block."""
    lane_need = 128 // math.gcd(patch, 128)      # cg multiple of this => cg*P % 128 == 0
    base = _lcm(8, lane_need)
    if C % base == 0 and C > base:
        return base
    return C


def _auto_s_tile(S, cg, patch, itemsize, s_step, vmem_budget_bytes=8 << 20):
    """Patch-axis tile: a multiple of s_step, sized so the double-buffered
    in+out blocks stay within ~vmem_budget_bytes."""
    per_s_bytes = cg * patch * itemsize
    cap = (vmem_budget_bytes // (4 * per_s_bytes)) // s_step * s_step
    cap = max(s_step, cap)
    return min(cap, _round_up(S, s_step))


def eeg_to_patch_tokens(x, patch_size, *, s_tile=None, channel_group=None):
    assert x.ndim == 3
    B, C, T = x.shape
    P = int(patch_size)
    S = _cdiv(T, P)                              # number of patches / tokens

    # Layout legality: input block last dim is s_tile*P (must be % 128 == 0),
    # output block second-minor dim is s_tile (must be % 8 == 0).
    s_step = _lcm(8, 128 // math.gcd(P, 128))

    cg = channel_group if channel_group is not None else _auto_channel_group(C, P)
    assert C % cg == 0
    assert cg == C or (cg % 8 == 0 and (cg * P) % 128 == 0)

    if s_tile is None:
        s_tile = _auto_s_tile(S, cg, P, x.dtype.itemsize, s_step)
    else:
        s_tile = max(s_step, _round_up(int(s_tile), s_step))

    lanes = s_tile * P
    n_cg = C // cg
    n_s = _cdiv(S, s_tile)
    # Mask only if any out-of-bounds (unspecified) input data is read at all.
    mask_tail = (n_s * lanes) != T

    kernel = functools.partial(
        _patch_tokens_kernel, cg=cg, s_tile=s_tile, patch=P,
        total_t=T, mask_tail=mask_tail)

    return pl.pallas_call(
        kernel,
        out_shape=jax.ShapeDtypeStruct((B, S, C * P), x.dtype),
        grid=(B, n_cg, n_s),
        # Batch dim squeezed (None); blocks sized to satisfy the (8, 128) rule:
        #   in  block: (cg, s_tile*P)   -- cg % 8 == 0 or cg == C; lanes % 128 == 0
        #   out block: (s_tile, cg*P)   -- s_tile % 8 == 0; cg*P % 128 == 0 or == C*P
        in_specs=[pl.BlockSpec((None, cg, lanes), lambda b, g, s: (b, g, s))],
        out_specs=pl.BlockSpec((None, s_tile, cg * P), lambda b, g, s: (b, s, g)),
        compiler_params=pltpu.CompilerParams(
            dimension_semantics=("parallel", "parallel", "parallel")),
    )(x)


def _reference(x, patch_size):
    # Pure-JAX reference of the PyTorch forward.
    B, C, T = x.shape
    spill = T % patch_size
    if spill != 0:
        pad = patch_size - spill
        x = jnp.concatenate([x, jnp.zeros((B, C, pad), dtype=x.dtype)], axis=-1)
    S = x.shape[-1] // patch_size
    x = x.reshape(B, C, S, patch_size)
    x = jnp.transpose(x, (0, 2, 1, 3))            # b s c p
    return x.reshape(B, S, C * patch_size)        # b s (c p)


if __name__ == "__main__":
    key = jax.random.PRNGKey(0)

    # Case 1: lane-dense tokens (C*P = 128), ragged time tail, several S-tiles.
    B, C, T, P = 2, 16, 998, 8
    x = jax.random.normal(key, (B, C, T), dtype=jnp.float32)
    out = jax.block_until_ready(eeg_to_patch_tokens(x, P, s_tile=32))
    ref = _reference(x, P)
    assert out.shape == ref.shape == (B, _cdiv(T, P), C * P)
    assert jnp.array_equal(out, ref), "case 1 mismatch vs reference"

    # Case 1b: automatic tile selection.
    out_auto = jax.block_until_ready(eeg_to_patch_tokens(x, P))
    assert jnp.array_equal(out_auto, ref), "case 1b mismatch vs reference"

    # Case 2: narrow token dim (C*P < 128), partial last S-tile.
    B2, C2, T2, P2 = 1, 4, 130, 8
    x2 = jax.random.normal(jax.random.PRNGKey(0), (B2, C2, T2), dtype=jnp.float32)
    out2 = jax.block_until_ready(eeg_to_patch_tokens(x2, P2, s_tile=16))
    ref2 = _reference(x2, P2)
    assert out2.shape == ref2.shape
    assert jnp.array_equal(out2, ref2), "case 2 mismatch vs reference"

    print("KERNEL_OK")
</pallas_src>

<mosaic_0001>
module attributes {stable_mosaic.version = 11 : i64} {
  func.func @_patch_tokens_kernel(%arg0: i32, %arg1: i32, %arg2: i32, %arg3: memref<1x16x256xf32, #tpu.memory_space<vmem>>, %arg4: memref<1x32x128xf32, #tpu.memory_space<vmem>>) attributes {dimension_semantics = [#tpu.dimension_semantics<parallel>, #tpu.dimension_semantics<parallel>, #tpu.dimension_semantics<parallel>], iteration_bounds = array<i64: 2, 1, 4>, scalar_prefetch = 0 : i64, scratch_operands = 0 : i64, tpu.core_type = #tpu.core_type<tc>, window_params = [{transform_indices = @transform_0, window_bounds = array<i64: 1, 16, 256>}, {transform_indices = @transform_1, window_bounds = array<i64: 1, 32, 128>}]} {
    %c0 = arith.constant 0 : index
    %c0_0 = arith.constant 0 : index
    %c0_1 = arith.constant 0 : index
    %0 = vector.load %arg3[%c0, %c0_0, %c0_1] : memref<1x16x256xf32, #tpu.memory_space<vmem>>, vector<1x16x256xf32>
    %1 = vector.shape_cast %0 : vector<1x16x256xf32> to vector<16x256xf32>
    %c256_i32 = arith.constant 256 : i32
    %2 = arith.muli %arg2, %c256_i32 : i32
    %3 = tpu.iota {dimensions = array<i32: 1>} : vector<16x256xi32>
    %4 = vector.broadcast %2 : i32 to vector<16x256xi32>
    %5 = arith.addi %4, %3 : vector<16x256xi32>
    %c998_i32 = arith.constant 998 : i32
    %6 = vector.broadcast %c998_i32 : i32 to vector<16x256xi32>
    %7 = arith.cmpi slt, %5, %6 : vector<16x256xi32>
    %cst = arith.constant 0.000000e+00 : f32
    %8 = vector.broadcast %cst : f32 to vector<16x256xf32>
    %9 = arith.select %7, %1, %8 : vector<16x256xi1>, vector<16x256xf32>
    %10 = vector.shape_cast %9 : vector<16x256xf32> to vector<16x32x8xf32>
    %11 = tpu.transpose %10, [1, 0, 2] : vector<16x32x8xf32> -> vector<32x16x8xf32>
    %12 = vector.shape_cast %11 : vector<32x16x8xf32> to vector<32x128xf32>
    %c0_2 = arith.constant 0 : index
    %c0_3 = arith.constant 0 : index
    %c0_4 = arith.constant 0 : index
    %13 = vector.load %arg4[%c0_2, %c0_3, %c0_4] : memref<1x32x128xf32, #tpu.memory_space<vmem>>, vector<1x32x128xf32>
    %14 = vector.shape_cast %13 : vector<1x32x128xf32> to vector<32x128xf32>
    %15 = vector.shape_cast %12 : vector<32x128xf32> to vector<1x32x128xf32>
    tpu.vector_store %arg4[%c0_2, %c0_3, %c0_4], %15 {strides = array<i32>} : memref<1x32x128xf32, #tpu.memory_space<vmem>>, vector<1x32x128xf32>,
    return
  }
  func.func @transform_0(%arg0: i32, %arg1: i32, %arg2: i32) -> (i32, i32, i32) {
    %c0_i32 = arith.constant 0 : i32
    return %arg0, %arg1, %arg2 : i32, i32, i32
  }
  func.func @transform_1(%arg0: i32, %arg1: i32, %arg2: i32) -> (i32, i32, i32) {
    %c0_i32 = arith.constant 0 : i32
    return %arg0, %arg2, %arg1 : i32, i32, i32
  }
}

</mosaic_0001>

<bundles_post_ra>
// kernel: tpu_custom_call.1
= control target key start
LH: loop header
LB: loop body
LE: loop exit
PB: predicated region body
PF: predicated region fallthrough
CT: control target
= control target key end

     0   :  { %6 = vsyncpa [#allocation3], 0  ;;  %s6514_s0 = inlined_call_operand.hbm [shape: f32[2,16,998], index: 0, kind: input, shape index: {}]   ;;  %s6515_s1 = inlined_call_operand.vmem [shape: f32[2,125,128], index: 1, kind: output, shape index: {}]  }
   0x1   :  { %8 = vsyncpa [#allocation3 + $0x1], 0  ;;  %s3745_s6 = smov 0   ;;  %s3747_s7 = smov 0  }
   0x2   :  { %s3749_s8 = smov 0   ;;  %s3751_s9 = smov 0  }
   0x3   :  { %s3753_s10 = smov 0   ;;  %s3755_s11 = smov 0  }
   0x4   :  { %s3757_s12 = smov 0   ;;  %s3759_s13 = smov 0  }
   0x5 LB: > { %s3510_s14 = sadd.s32 4294967295, %s3713_s13   ;;  %s26_s15 = sadd.s32 1, %s3705_s11  ;;  %s3713_s13 = sphi %s3759_s13, %s14_s13   ;;  %s3709_s12 = sphi %s3757_s12, %s6776_s12   ;;  %s3705_s11 = sphi %s3755_s11, %s6775_s11   ;;  %s3701_s10 = sphi %s3753_s10, %s6774_s10   ;;  %s3697_s9 = sphi %s3751_s9, %s6773_s9   ;;  %s3693_s8 = sphi %s3749_s8, %s6772_s8   ;;  %s3689_s7 = sphi %s3747_s7, %s6771_s7   ;;  %s3685_s6 = sphi %s3745_s6, %s6770_s6  }
   0x6   : > { %p27_p0 = scmp.ge.s32.totalorder %s26_s15, 4  ;;  %s33_s16 = sadd.s32 1, %s3709_s12 }
   0x7   : > { %s44_s17 = sadd.s32 1, %s3693_s8  ;;  %p51_p1 = scmp.ne.s32.totalorder %s3693_s8, %s3689_s7 }
   0x8   : > { %s6778_s15 = smov (%p27_p0, %s26_s15), 0  ;;  %s6780_s16 = smov (!%p27_p0, %s33_s16), %s3709_s12 }
   0x9   : > { %s40_s18 = ssub.s32 %s3705_s11, %s6778_s15  ;;  %p52_p2 = scmp.eq.s32.totalorder %s3713_s13, 0 }
   0xa   : > { %p35_p3 = scmp.ge.s32.totalorder %s6780_s16, 2  ;;  %p57_p4 = scmp.ne.s32.totalorder %s3689_s7, %s3685_s6 }
   0xb   : > { %p3796_p5 = por %p52_p2, %p51_p1  ;;  %p58_p6 = scmp.eq.s32.totalorder %s3510_s14, 0 }
   0xc   : > { %s6782_s16 = smov (%p35_p3, %s6780_s16), 0  ;;  %p3532_p8 = scmp.lt.s32.totalorder %s3713_s13, 8 }
   0xd   : > { %p3802_p7 = por %p58_p6, %p57_p4  ;;  %s37_s21 = ssub.s32 %s3709_s12, %s6782_s16 }
   0xe   : > { %s41_s22 = sor.u32 %s40_s18, %s37_s21  ;;  %s111_s23 = sand.u32 1, %s3693_s8  }
   0xf   : > { %p42_p9 = scmp.eq.s32.totalorder %s41_s22, 0  ;;  %s3514_s24 = sshll.u32 %s111_s23, 5 }
  0x10   : > { %s3515_s25 = sshll.u32 %s3705_s11, 1  ;;  %s3516_s27 = sshll.u32 %s3709_s12, 4 }
  0x11   : > { %s3812_s26 = scalar_select %p42_p9, %s3693_s8, %s44_s17  }
  0x12   : > { %s123_s28 = sadd.s32 %s3516_s27, %s3515_s25  ;;  %s115_s29 = scalar_lea.vmem [#allocation2], %s3514_s24 }
  0x13   : > { %s128_s30 = sshll.u32 %s115_s29, 4  ;;  %s3517_s2 = sshll.u32 %s123_s28, 3  ;;  %s129_s30 = int_to_ptr.vmem [resolvable:$true] %s128_s30 }
  0x14   : > { %s125_s5 = scalar_lea.hbm %s6514_s0, %s3517_s2  ;;  %p3529_p10 = pnand %p3532_p8, %p3796_p5 }
  0x15   : > { %s126_s6 = sshll.u32 %s125_s5, 4  ;;  %s112_s14 = scalar_lea.sflag [#allocation3], %s111_s23  ;;  %s127_s6 = int_to_ptr.hbm [resolvable:$true] %s126_s6 }
  0x16   : > { %s3715_s17 = smov 1024   ;;  %s3716_s18 = smov 256  }
  0x17   : > { %s3717_s21 = smov 16   ;;  %p3518_p11 = scmp.ge.s32.totalorder %s3713_s13, 1 }
  0x18   : > { %3531 = dma.hbm_to_vmem [thread:$0]  (!%p3529_p10), %s127_s6, 512, %s129_s30, %s112_s14, %s3715_s17, %s3716_s18, %s3717_s21  }
  0x19   : > { %p136_p12 = scmp.lt.s32.totalorder %s3713_s13, 9 }
  0x1b   : > { %p137_p13 = pnand %p3518_p11, %p136_p12 }
  0x1d   : > { %140 = sbr.rel (%p137_p13) target bundleno = 720 (0x2d0), region = 24 }
  0x22   : > { %s142_s22 = sand.u32 1, %s3689_s7  }
  0x23   : > { %s3519_s24 = sshll.u32 %s142_s22, 5  ;;  %s143_s25 = scalar_lea.sflag [#allocation3], %s142_s22 }
  0x24   : > { %s3825_s27 = scalar_lea.vmem [#allocation2], %s3519_s24 }
  0x25   : > { %3680 = dma.done.wait (%p3802_p7), %s143_s25, 512  }
  0x26   : > { %3682 = vsyncadd (%p3802_p7), %s143_s25, 4294966784  ;;  %s3523_s19 = sshll.u32 %s3697_s9, 8  ;;  %v193_v0 = vlaneseq  ;;  %v188_v4 = vld [vmem:[%s3825_s27] sm:$0xff]  ;;  %s3718_s23 = smov 112   ;;  %v190_v6 = vld [vmem:[%s3825_s27 + $0x10] sm:$0xff]  ;;  %vm390_vm2 = vcmask 1047556  }
  0x27   : > { %v196_v1 = vstv %s3523_s19  ;;  %s3719_s28 = smov 120   ;;  %s3720_s20 = smov 104   ;;  %v191_v10 = vld [vmem:[%s3825_s27 + $0x18] sm:$0xff]  ;;  %v189_v11 = vld [vmem:[%s3825_s27 + $0x8] sm:$0xff]  ;;  %v3733_v19 = vmov 1983009808  }
  0x28   : > { %v194_v2 = vand.u32 127, %v193_v0  ;;  %s3721_s29 = smov 96   ;;  %s3722_s30 = smov 88   ;;  %v395_v20 = vunpack.c.l.s4 %v3733_v19  ;;  %v3734_v56 = vmov 1934713408   ;;  %vm3318_vm3 = vcmask 64512  }
  0x29   : > { %s3723_s2 = smov 80   ;;  %s3724_s3 = smov 72   ;;  %v443_v57 = vunpack.c.l.s4 %v3734_v56  ;;  %vm3323_vm4 = vcmask 130048   ;;  %vm3328_vm5 = vcmask 195584   ;;  %vm3333_vm6 = vcmask 261120  }
  0x2a   : > { %v197_v3 = vadd.s32 %v196_v1, %v194_v2  ;;  %s3725_s4 = smov 64   ;;  %s3726_s5 = smov 56   ;;  %v195_v8 = vadd.s32 128, %v194_v2  ;;  %v3942_v26 = vunpack.c.0.s8 %v395_v20  ;;  %vm3338_vm7 = vcmask 326656  }
  0x2b   : > { %s3727_s6 = smov 48   ;;  %s3728_s14 = smov 40   ;;  %vm3343_vm8 = vcmask 392192   ;;  %vm3348_vm9 = vcmask 457728   ;;  %vm3353_vm10 = vcmask 523264   ;;  %vm3358_vm11 = vcmask 588800  }
  0x2c   : > { %vm199_vm0 = vcmp.lt.s32.totalorder %v197_v3, 998  ;;  %v198_v9 = vadd.s32 %v196_v1, %v195_v8  ;;  %s3729_s17 = smov 32   ;;  %s3730_s18 = smov 24   ;;  %vm3363_vm12 = vcmask 654336   ;;  %vm3368_vm13 = vcmask 719872  }
  0x2d   : > { %v3833_v5 = vsel %vm199_vm0, %v188_v4, 0.0  ;;  %v3842_v7 = vsel %vm199_vm0, %v190_v6, 0.0  ;;  %s3731_s21 = smov 16   ;;  %s3732_s22 = smov 8   ;;  %vm3373_vm14 = vcmask 785408   ;;  %vm3378_vm15 = vcmask 850944  }
  0x2e   : > { %213 = vrot.lane.b32.xlu1 %v3833_v5, %s3718_s23  ;;  %207 = vrot.lane.b32.xlu0 %v3833_v5, %s3719_s28  ;;  %vm200_vm1 = vcmp.lt.s32.totalorder %v198_v9, 998  ;;  %v392_v23 = vrot.slane %v3833_v5, 4  ;;  %v840_v25 = vrot.slane %v3842_v7, 4  ;;  %s3520_s24 = sshll.u32 %s3697_s9, 2  ;;  %p176_p0 = scmp.lt.s32.totalorder %s3701_s10, 1  ;;  %vm3388_vm0 = vcmask 982016  }
  0x2f   : > { %219 = vrot.lane.b32.xlu2 %v3833_v5, %s3720_s20  ;;  %v3900_v12 = vsel %vm200_vm1, %v191_v10, 0.0  ;;  %v3902_v13 = vsel %vm200_vm1, %v189_v11, 0.0  ;;  %p178_p1 = scmp.lt.s32.totalorder %s3520_s24, 15  ;;  %vm3383_vm1 = vcmask 916480  }
  0x30   : > { %s6784_s10 = smov (!%p176_p0, %s3701_s10), 1 }
  0x31   : > { %s6786_s24 = smov (!%p178_p1, %s3520_s24), 15  ;;  %s3521_s25 = sshll.u32 %s6784_s10, 4 }
  0x32   : > { %s184_s9 = sadd.s32 %s3521_s25, %s6786_s24 }
  0x33   : > { %s3522_s27 = sshll.u32 %s184_s9, 3 }
  0x36   : > { %215 = vrot.lane.b32.xlu1 %v3842_v7, %s3718_s23  ;;  %209 = vrot.lane.b32.xlu0 %v3842_v7, %s3719_s28 }
  0x37   : > { %221 = vrot.lane.b32.xlu2 %v3842_v7, %s3720_s20 }
  0x3e   : > { %227 = vrot.lane.b32.xlu1 %v3842_v7, %s3721_s29  ;;  %225 = vrot.lane.b32.xlu0 %v3833_v5, %s3721_s29 }
  0x3f   : > { %231 = vrot.lane.b32.xlu2 %v3833_v5, %s3722_s30 }
  0x46   : > { %237 = vrot.lane.b32.xlu1 %v3833_v5, %s3723_s2  ;;  %233 = vrot.lane.b32.xlu0 %v3842_v7, %s3722_s30 }
  0x47   : > { %239 = vrot.lane.b32.xlu2 %v3842_v7, %s3723_s2 }
  0x4e   : > { %245 = vrot.lane.b32.xlu1 %v3842_v7, %s3724_s3  ;;  %243 = vrot.lane.b32.xlu0 %v3833_v5, %s3724_s3 }
  0x4f   : > { %249 = vrot.lane.b32.xlu2 %v3833_v5, %s3725_s4 }
  0x56   : > { %255 = vrot.lane.b32.xlu1 %v3833_v5, %s3726_s5  ;;  %251 = vrot.lane.b32.xlu0 %v3842_v7, %s3725_s4 }
  0x57   : > { %257 = vrot.lane.b32.xlu2 %v3842_v7, %s3726_s5 }
  0x5e   : > { %263 = vrot.lane.b32.xlu1 %v3842_v7, %s3727_s6  ;;  %261 = vrot.lane.b32.xlu0 %v3833_v5, %s3727_s6 }
  0x5f   : > { %267 = vrot.lane.b32.xlu2 %v3833_v5, %s3728_s14 }
  0x66   : > { %273 = vrot.lane.b32.xlu1 %v3833_v5, %s3729_s17  ;;  %269 = vrot.lane.b32.xlu0 %v3842_v7, %s3728_s14 }
  0x67   : > { %275 = vrot.lane.b32.xlu2 %v3842_v7, %s3729_s17 }
  0x6e   : > { %281 = vrot.lane.b32.xlu1 %v3842_v7, %s3730_s18  ;;  %279 = vrot.lane.b32.xlu0 %v3833_v5, %s3730_s18 }
  0x6f   : > { %285 = vrot.lane.b32.xlu2 %v3833_v5, %s3731_s21 }
  0x76   : > { %291 = vrot.lane.b32.xlu1 %v3833_v5, %s3732_s22  ;;  %287 = vrot.lane.b32.xlu0 %v3842_v7, %s3731_s21 }
  0x77   : > { %293 = vrot.lane.b32.xlu2 %v3842_v7, %s3732_s22 }
  0x7e   : > { %301 = vrot.lane.b32.xlu1 %v3900_v12, %s3719_s28  ;;  %299 = vrot.lane.b32.xlu0 %v3902_v13, %s3719_s28 }
  0x7f   : > { %305 = vrot.lane.b32.xlu2 %v3902_v13, %s3718_s23 }
  0x86   : > { %311 = vrot.lane.b32.xlu1 %v3902_v13, %s3720_s20  ;;  %307 = vrot.lane.b32.xlu0 %v3900_v12, %s3718_s23 }
  0x87   : > { %313 = vrot.lane.b32.xlu2 %v3900_v12, %s3720_s20 }
  0x89   : > { %v220_v14 = vpop.permute.xlu2 %219 }
  0x8a   : > { %v402_v22 = vrot.slane %v220_v14, 4 }
  0x8e   : > { %319 = vrot.lane.b32.xlu1 %v3900_v12, %s3721_s29  ;;  %317 = vrot.lane.b32.xlu0 %v3902_v13, %s3721_s29 }
  0x8f   : > { %323 = vrot.lane.b32.xlu2 %v3902_v13, %s3722_s30 }
  0x91   : > { %v222_v15 = vpop.permute.xlu2 %221 }
  0x92   : > { %v850_v24 = vrot.slane %v222_v15, 4 }
  0x96   : > { %329 = vrot.lane.b32.xlu1 %v3902_v13, %s3723_s2  ;;  %325 = vrot.lane.b32.xlu0 %v3900_v12, %s3722_s30 }
  0x97   : > { %331 = vrot.lane.b32.xlu2 %v3900_v12, %s3723_s2 }
  0x99   : > { %v3928_v16 = vpop.permute.xlu2 %231 }
  0x9e   : > { %337 = vrot.lane.b32.xlu1 %v3900_v12, %s3724_s3  ;;  %335 = vrot.lane.b32.xlu0 %v3902_v13, %s3724_s3 }
  0x9f   : > { %341 = vrot.lane.b32.xlu2 %v3902_v13, %s3725_s4 }
  0xa0   : > { %v214_v17 = vpop.permute.xlu1 %213  ;;  %v208_v18 = vpop.permute.xlu0 %207 }
  0xa1   : > { %v240_v21 = vpop.permute.xlu2 %239  ;;  %v389_v27 = vrot.slane %v214_v17, 4  ;;  %v403_v28 = vsel %vm390_vm2, %v402_v22, %v208_v18  ;;  %v404_v29 = vrot.slane %v208_v18, 4  ;;  %v393_v32 = vsel %vm390_vm2, %v214_v17, %v392_v23 }
  0xa2   : > { %v409_v38 = vperm.slane %v403_v28, %v3942_v26  ;;  %v862_v44 = vrot.slane %v240_v21, 4  ;;  %v401_v51 = vperm.slane %v393_v32, %v3942_v26 }
  0xa3   : > { %v391_v37 = vsel %vm390_vm2, %v389_v27, %v3833_v5  ;;  %v405_v41 = vsel %vm390_vm2, %v220_v14, %v404_v29  ;;  %v3978_v5 = vunpack.c.0.s8 %v443_v57 }
  0xa4   : > { %v397_v50 = vperm.slane %v391_v37, %v3942_v26  ;;  %v413_v58 = vperm.slane %v405_v41, %v3942_v26  ;;  %v438_v59 = vrot.slane %v409_v38, 4  ;;  %v452_v2 = vrot.slane %v401_v51, 4 }
  0xa6   : > { %347 = vrot.lane.b32.xlu1 %v3902_v13, %s3726_s5  ;;  %343 = vrot.lane.b32.xlu0 %v3900_v12, %s3725_s4  ;;  %v440_v3 = vrot.slane %v397_v50, 4  ;;  %v450_v6 = vrot.slane %v413_v58, 4  ;;  %v453_v8 = vsel %vm390_vm2, %v413_v58, %v452_v2 }
  0xa7   : > { %349 = vrot.lane.b32.xlu2 %v3900_v12, %s3726_s5  ;;  %v3996_v18 = vperm.slane %v453_v8, %v3978_v5 }
  0xa8   : > { %v216_v30 = vpop.permute.xlu1 %215  ;;  %v210_v31 = vpop.permute.xlu0 %209  ;;  %v441_v9 = vsel %vm390_vm2, %v409_v38, %v440_v3  ;;  %v451_v14 = vsel %vm390_vm2, %v450_v6, %v401_v51 }
  0xa9   : > { %v838_v33 = vrot.slane %v216_v30, 4  ;;  %v841_v34 = vsel %vm390_vm2, %v216_v30, %v840_v25  ;;  %v851_v35 = vsel %vm390_vm2, %v850_v24, %v210_v31  ;;  %v852_v36 = vrot.slane %v210_v31, 4  ;;  %v3961_v49 = vpop.permute.xlu2 %249 }
  0xaa   : > { %v849_v39 = vperm.slane %v841_v34, %v3942_v26  ;;  %v857_v40 = vperm.slane %v851_v35, %v3942_v26  ;;  %v4002_v22 = vperm.slane %v451_v14, %v3978_v5  ;;  %v428_v25 = vrot.slane %v3928_v16, 4 }
  0xab   : > { %v839_v42 = vsel %vm390_vm2, %v838_v33, %v3842_v7  ;;  %v853_v43 = vsel %vm390_vm2, %v222_v15, %v852_v36  ;;  %v439_v7 = vsel %vm390_vm2, %v438_v59, %v397_v50  ;;  %v500_v28 = vrot.slane %v3996_v18, 4 }
  0xac   : > { %v845_v45 = vperm.slane %v839_v42, %v3942_v26  ;;  %v900_v46 = vrot.slane %v849_v39, 4  ;;  %v861_v47 = vperm.slane %v853_v43, %v3942_v26  ;;  %v886_v48 = vrot.slane %v857_v40, 4 }
  0xad   : > { %v3992_v11 = vperm.slane %v439_v7, %v3978_v5  ;;  %v496_v36 = vrot.slane %v4002_v22, 4 }
  0xae   : > { %355 = vrot.lane.b32.xlu1 %v3900_v12, %s3727_s6  ;;  %353 = vrot.lane.b32.xlu0 %v3902_v13, %s3727_s6  ;;  %v888_v52 = vrot.slane %v845_v45, 4  ;;  %v887_v53 = vsel %vm390_vm2, %v886_v48, %v845_v45  ;;  %v898_v54 = vrot.slane %v861_v47, 4  ;;  %v901_v55 = vsel %vm390_vm2, %v861_v47, %v900_v46 }
  0xaf   : > { %359 = vrot.lane.b32.xlu2 %v3902_v13, %s3728_s14  ;;  %v4005_v23 = vperm.slane %v887_v53, %v3978_v5  ;;  %v488_v24 = vrot.slane %v3992_v11, 4  ;;  %v4010_v27 = vperm.slane %v901_v55, %v3978_v5 }
  0xb0   : > { %v228_v60 = vpop.permute.xlu1 %227  ;;  %v226_v61 = vpop.permute.xlu0 %225  ;;  %v889_v62 = vsel %vm390_vm2, %v857_v40, %v888_v52  ;;  %v899_v63 = vsel %vm390_vm2, %v898_v54, %v849_v39  ;;  %v504_v39 = vrot.slane %v3961_v49, 4 }
  0xb1   : > { %v863_v0 = vsel %vm390_vm2, %v862_v44, %v228_v60  ;;  %v864_v1 = vrot.slane %v228_v60, 4  ;;  %v3987_v10 = vpop.permute.xlu2 %257  ;;  %v416_v19 = vrot.slane %v226_v61, 4  ;;  %v4017_v33 = vperm.slane %v889_v62, %v3978_v5 }
  0xb2   : > { %v4020_v34 = vperm.slane %v899_v63, %v3978_v5  ;;  %v936_v37 = vrot.slane %v4005_v23, 4  ;;  %v869_v38 = vperm.slane %v863_v0, %v3942_v26  ;;  %v948_v40 = vrot.slane %v4010_v27, 4 }
  0xb3   : > { %v865_v4 = vsel %vm390_vm2, %v240_v21, %v864_v1  ;;  %v3999_v21 = vperm.slane %v441_v9, %v3978_v5  ;;  %v964_v43 = vrot.slane %v3987_v10, 4  ;;  %v940_v51 = vrot.slane %v4017_v33, 4 }
  0xb4   : > { %v873_v35 = vperm.slane %v865_v4, %v3942_v26  ;;  %v944_v52 = vrot.slane %v4020_v34, 4  ;;  %v912_v56 = vrot.slane %v869_v38, 4 }
  0xb5   : > { %v492_v32 = vrot.slane %v3999_v21, 4 }
  0xb6   : > { %365 = vrot.lane.b32.xlu1 %v3902_v13, %s3729_s17  ;;  %361 = vrot.lane.b32.xlu0 %v3900_v12, %s3728_s14  ;;  %v924_v53 = vrot.slane %v873_v35, 4 }
  0xb7   : > { %367 = vrot.lane.b32.xlu2 %v3900_v12, %s3729_s17 }
  0xb8   : > { %v238_v15 = vpop.permute.xlu1 %237  ;;  %v234_v17 = vpop.permute.xlu0 %233 }
  0xb9   : > { %v414_v20 = vrot.slane %v238_v15, 4  ;;  %v417_v30 = vsel %vm390_vm2, %v238_v15, %v416_v19  ;;  %v876_v31 = vrot.slane %v234_v17, 4  ;;  %v4044_v55 = vpop.permute.xlu2 %267 }
  0xba   : > { %v4036_v42 = vperm.slane %v417_v30, %v3942_v26  ;;  %v514_v3 = vrot.slane %v4044_v55, 4 }
  0xbb   : > { %v415_v29 = vsel %vm390_vm2, %v414_v20, %v226_v61 }
  0xbc   : > { %v421_v41 = vperm.slane %v415_v29, %v3942_v26  ;;  %v476_v1 = vrot.slane %v4036_v42, 4 }
  0xbe   : > { %373 = vrot.lane.b32.xlu1 %v3900_v12, %s3730_s18  ;;  %371 = vrot.lane.b32.xlu0 %v3902_v13, %s3730_s18  ;;  %v464_v0 = vrot.slane %v421_v41, 4 }
  0xbf   : > { %377 = vrot.lane.b32.xlu2 %v3902_v13, %s3731_s21 }
  0xc0   : > { %v246_v44 = vpop.permute.xlu1 %245  ;;  %v244_v45 = vpop.permute.xlu0 %243 }
  0xc1   : > { %v874_v46 = vrot.slane %v246_v44, 4  ;;  %v877_v47 = vsel %vm390_vm2, %v246_v44, %v876_v31  ;;  %v426_v48 = vrot.slane %v244_v45, 4  ;;  %v429_v50 = vsel %vm390_vm2, %v244_v45, %v428_v25 }
  0xc2   : > { %v885_v54 = vperm.slane %v877_v47, %v3942_v26  ;;  %v4050_v59 = vperm.slane %v429_v50, %v3942_v26 }
  0xc3   : > { %v875_v57 = vsel %vm390_vm2, %v874_v46, %v234_v17  ;;  %v427_v58 = vsel %vm390_vm2, %v426_v48, %v3928_v16 }
  0xc4   : > { %v881_v60 = vperm.slane %v875_v57, %v3942_v26  ;;  %v922_v61 = vrot.slane %v885_v54, 4  ;;  %v925_v62 = vsel %vm390_vm2, %v885_v54, %v924_v53  ;;  %v433_v63 = vperm.slane %v427_v58, %v3942_v26 }
  0xc5   : > { %v933_v2 = vperm.slane %v925_v62, %v3978_v5  ;;  %v474_v25 = vrot.slane %v4050_v59, 4 }
  0xc6   : > { %v910_v4 = vrot.slane %v881_v60, 4  ;;  %v913_v16 = vsel %vm390_vm2, %v881_v60, %v912_v56  ;;  %v923_v6 = vsel %vm390_vm2, %v922_v61, %v873_v35  ;;  %v462_v7 = vrot.slane %v433_v63, 4  ;;  %383 = vrot.lane.b32.xlu1 %v3902_v13, %s3732_s22  ;;  %379 = vrot.lane.b32.xlu0 %v3900_v12, %s3731_s21 }
  0xc7   : > { %v921_v8 = vperm.slane %v913_v16, %v3978_v5  ;;  %v929_v9 = vperm.slane %v923_v6, %v3978_v5  ;;  %v946_v14 = vrot.slane %v933_v2, 4  ;;  %v949_v15 = vsel %vm390_vm2, %v933_v2, %v948_v40  ;;  %385 = vrot.lane.b32.xlu2 %v3900_v12, %s3732_s22 }
  0xc8   : > { %v911_v17 = vsel %vm390_vm2, %v910_v4, %v869_v38  ;;  %v1434_v19 = vrot.slane %v949_v15, 4  ;;  %v463_v20 = vsel %vm390_vm2, %v462_v7, %v421_v41  ;;  %v465_v46 = vsel %vm390_vm2, %v433_v63, %v464_v0  ;;  %v4084_v54 = vpop.permute.xlu1 %255  ;;  %v4110_v6 = vpop.permute.xlu0 %251 }
  0xc9   : > { %v917_v29 = vperm.slane %v911_v17, %v3978_v5  ;;  %v938_v30 = vrot.slane %v921_v8, 4  ;;  %v941_v31 = vsel %vm390_vm2, %v921_v8, %v940_v51  ;;  %v942_v35 = vrot.slane %v929_v9, 4 }
  0xca   : > { %v945_v44 = vsel %vm390_vm2, %v929_v9, %v944_v52  ;;  %v947_v40 = vsel %vm390_vm2, %v946_v14, %v4010_v27  ;;  %v1410_v45 = vrot.slane %v941_v31, 4  ;;  %v469_v16 = vperm.slane %v463_v20, %v3978_v5 }
  0xcb   : > { %v934_v38 = vrot.slane %v917_v29, 4  ;;  %v937_v47 = vsel %vm390_vm2, %v917_v29, %v936_v37  ;;  %v939_v41 = vsel %vm390_vm2, %v938_v30, %v4017_v33  ;;  %v943_v48 = vsel %vm390_vm2, %v942_v35, %v4020_v34 }
  0xcc   : > { %v1398_v50 = vrot.slane %v939_v41, 4  ;;  %v1411_v51 = vsel %vm390_vm2, %v1410_v45, %v937_v47  ;;  %v1412_v53 = vrot.slane %v937_v47, 4  ;;  %v1422_v52 = vrot.slane %v947_v40, 4  ;;  %v4136_v45 = vpop.permute.xlu2 %275 }
  0xcd   : > { %v935_v27 = vsel %vm390_vm2, %v934_v38, %v4005_v23  ;;  %v4089_v56 = vperm.slane %v1411_v51, %v3942_v26  ;;  %v1424_v37 = vrot.slane %v943_v48, 4  ;;  %v1435_v57 = vsel %vm390_vm2, %v1434_v19, %v945_v44 }
  0xce   : > { %v1399_v33 = vsel %vm390_vm2, %v1398_v50, %v935_v27  ;;  %v1400_v58 = vrot.slane %v935_v27, 4  ;;  %v1413_v34 = vsel %vm390_vm2, %v941_v31, %v1412_v53  ;;  %v1423_v60 = vsel %vm390_vm2, %v1422_v52, %v943_v48 }
  0xcf   : > { %6577 = vst [vmem:[#allocation5_spill] sm:$0xff] %v4089_v56  ;;  %v4096_v61 = vperm.slane %v1399_v33, %v3942_v26  ;;  %v4099_v62 = vperm.slane %v1413_v34, %v3942_v26  ;;  %v1425_v23 = vsel %vm390_vm2, %v947_v40, %v1424_v37  ;;  %v4103_v63 = vperm.slane %v1423_v60, %v3942_v26 }
  0xd0   : > { %v1401_v0 = vsel %vm390_vm2, %v939_v41, %v1400_v58  ;;  %v4107_v2 = vperm.slane %v1425_v23, %v3942_v26  ;;  %v1436_v4 = vrot.slane %v945_v44, 4  ;;  %v4116_v8 = vperm.slane %v1435_v57, %v3942_v26  ;;  %v264_v51 = vpop.permute.xlu1 %263 }
  0xd1   : > { %6578 = vst [vmem:[#allocation6_spill] sm:$0xff] %v4096_v61  ;;  %v4113_v7 = vperm.slane %v1401_v0, %v3942_v26  ;;  %v477_v14 = vsel %vm390_vm2, %v4050_v59, %v476_v1  ;;  %v1472_v29 = vrot.slane %v4103_v63, 4  ;;  %v473_v35 = vperm.slane %v465_v46, %v3978_v5 }
  0xd2   : > { %6579 = vst [vmem:[#allocation7_spill] sm:$0xff] %v4099_v62  ;;  %v1437_v17 = vsel %vm390_vm2, %v949_v15, %v1436_v4  ;;  %v1484_v20 = vrot.slane %v4107_v2, 4  ;;  %v475_v44 = vsel %vm390_vm2, %v474_v25, %v4036_v42  ;;  %v485_v15 = vperm.slane %v477_v14, %v3978_v5  ;;  %v262_v4 = vpop.permute.xlu0 %261 }
  0xd3   : > { %6580 = vst [vmem:[#allocation8_spill] sm:$0xff] %v4103_v63  ;;  %v4126_v30 = vperm.slane %v1437_v17, %v3942_v26  ;;  %v1473_v59 = vsel %vm390_vm2, %v4116_v8, %v1472_v29  ;;  %v481_v1 = vperm.slane %v475_v44, %v3978_v5  ;;  %v486_v40 = vrot.slane %v469_v16, 4 }
  0xd4   : > { %6581 = vst [vmem:[#allocation9_spill] sm:$0xff] %v4107_v2  ;;  %v489_v42 = vsel %vm390_vm2, %v469_v16, %v488_v24  ;;  %v4146_v25 = vperm.slane %v1473_v59, %v3978_v5  ;;  %v490_v48 = vrot.slane %v473_v35, 4  ;;  %v493_v50 = vsel %vm390_vm2, %v473_v35, %v492_v32 }
  0xd5   : > { %6582 = vst [vmem:[#allocation10_spill] sm:$0xff] %v4113_v7  ;;  %v1485_v46 = vsel %vm390_vm2, %v4126_v30, %v1484_v20  ;;  %v487_v41 = vsel %vm390_vm2, %v486_v40, %v3992_v11  ;;  %v494_v53 = vrot.slane %v481_v1, 4  ;;  %v497_v52 = vsel %vm390_vm2, %v481_v1, %v496_v36 }
  0xd6   : > { %6583 = vst [vmem:[#allocation11_spill] sm:$0xff] %v4116_v8  ;;  %v498_v27 = vrot.slane %v485_v15, 4  ;;  %v501_v24 = vsel %vm390_vm2, %v485_v15, %v500_v28  ;;  %v491_v37 = vsel %vm390_vm2, %v490_v48, %v3999_v21  ;;  %v1288_v11 = vrot.slane %v487_v41, 4  ;;  %v286_v48 = vpop.permute.xlu2 %285 }
  0xd7   : > { %6584 = vst [vmem:[#allocation12_spill] sm:$0xff] %v4126_v30  ;;  %v1298_v57 = vrot.slane %v493_v50, 4  ;;  %v1300_v33 = vrot.slane %v489_v42, 4  ;;  %v495_v32 = vsel %vm390_vm2, %v494_v53, %v4002_v22  ;;  %v1286_v34 = vrot.slane %v491_v37, 4 }
  0xd8   : > { %6585 = vst [vmem:[#allocation13_spill] sm:$0xff] %v4146_v25  ;;  %v499_v58 = vsel %vm390_vm2, %v498_v27, %v3996_v18  ;;  %v1322_v60 = vrot.slane %v501_v24, 4  ;;  %v1289_v36 = vsel %vm390_vm2, %v491_v37, %v1288_v11  ;;  %v1312_v29 = vrot.slane %v495_v32, 4 }
  0xd9   : > { %v1299_v23 = vsel %vm390_vm2, %v1298_v57, %v489_v42  ;;  %v1301_v28 = vsel %vm390_vm2, %v493_v50, %v1300_v33  ;;  %v1310_v0 = vrot.slane %v499_v58, 4  ;;  %v1287_v16 = vsel %vm390_vm2, %v1286_v34, %v487_v41  ;;  %v274_v33 = vpop.permute.xlu1 %273 }
  0xda   : > { %v4171_v14 = vperm.slane %v1299_v23, %v3942_v26  ;;  %v4174_v22 = vperm.slane %v1301_v28, %v3942_v26  ;;  %v4177_v18 = vperm.slane %v1287_v16, %v3942_v26  ;;  %v1323_v20 = vsel %vm390_vm2, %v1322_v60, %v497_v52 }
  0xdb   : > { %v1311_v17 = vsel %vm390_vm2, %v1310_v0, %v495_v32  ;;  %v4182_v35 = vperm.slane %v1485_v46, %v3978_v5  ;;  %v4185_v44 = vperm.slane %v1289_v36, %v3942_v26  ;;  %v1324_v1 = vrot.slane %v497_v52, 4 }
  0xdc   : > { %v4188_v59 = vperm.slane %v1311_v17, %v3942_v26  ;;  %v1313_v15 = vsel %vm390_vm2, %v499_v58, %v1312_v29  ;;  %v4192_v40 = vperm.slane %v1323_v20, %v3942_v26  ;;  %v1334_v42 = vrot.slane %v4171_v14, 4 }
  0xdd   : > { %6586 = vst [vmem:[#allocation14_spill] sm:$0xff] %v4182_v35  ;;  %v1336_v41 = vrot.slane %v4177_v18, 4  ;;  %v4197_v46 = vperm.slane %v1313_v15, %v3942_v26  ;;  %v1325_v50 = vsel %vm390_vm2, %v501_v24, %v1324_v1  ;;  %v1346_v53 = vrot.slane %v4174_v22, 4  ;;  %v270_v1 = vpop.permute.xlu0 %269 }
  0xde   : > { %v1360_v27 = vrot.slane %v4188_v59, 4  ;;  %v4203_v52 = vperm.slane %v1325_v50, %v3942_v26  ;;  %v515_v37 = vsel %vm390_vm2, %v514_v3, %v4084_v54  ;;  %v516_v11 = vrot.slane %v4084_v54, 4  ;;  %v294_v21 = vpop.permute.xlu2 %293 }
  0xdf   : > { %v952_v57 = vrot.slane %v4110_v6, 4  ;;  %v1348_v32 = vrot.slane %v4185_v44, 4  ;;  %v1372_v58 = vrot.slane %v4197_v46, 4  ;;  %v521_v34 = vperm.slane %v515_v37, %v3942_v26 }
  0xe0   : > { %v1361_v24 = vsel %vm390_vm2, %v4192_v40, %v1360_v27  ;;  %v1358_v60 = vrot.slane %v4192_v40, 4  ;;  %v517_v36 = vsel %vm390_vm2, %v4044_v55, %v516_v11  ;;  %v976_v3 = vrot.slane %v4136_v45, 4 }
  0xe1   : > { %v950_v54 = vrot.slane %v264_v51, 4  ;;  %v4221_v23 = vperm.slane %v1361_v24, %v3978_v5  ;;  %v1373_v28 = vsel %vm390_vm2, %v4203_v52, %v1372_v58  ;;  %v525_v0 = vperm.slane %v517_v36, %v3942_v26 }
  0xe2   : > { %v953_v16 = vsel %vm390_vm2, %v264_v51, %v952_v57  ;;  %v1370_v17 = vrot.slane %v4203_v52, 4  ;;  %v550_v29 = vrot.slane %v521_v34, 4  ;;  %v502_v55 = vrot.slane %v262_v4, 4 }
  0xe3   : > { %v951_v20 = vsel %vm390_vm2, %v950_v54, %v4110_v6  ;;  %v4231_v15 = vperm.slane %v1373_v28, %v3978_v5  ;;  %v961_v50 = vperm.slane %v953_v16, %v3942_v26  ;;  %v505_v27 = vsel %vm390_vm2, %v262_v4, %v504_v39 }
  0xe4   : > { %v526_v37 = vrot.slane %v286_v48, 4  ;;  %v562_v11 = vrot.slane %v525_v0, 4  ;;  %v503_v51 = vsel %vm390_vm2, %v502_v55, %v3961_v49  ;;  %v513_v57 = vperm.slane %v505_v27, %v3942_v26 }
  0xe5   : > { %v528_v24 = vrot.slane %v274_v33, 4  ;;  %v957_v6 = vperm.slane %v951_v20, %v3942_v26  ;;  %v509_v58 = vperm.slane %v503_v51, %v3942_v26  ;;  %v962_v54 = vrot.slane %v270_v1, 4  ;;  %v282_v51 = vpop.permute.xlu1 %281 }
  0xe6   : > { %v527_v36 = vsel %vm390_vm2, %v526_v37, %v274_v33  ;;  %v563_v28 = vsel %vm390_vm2, %v562_v11, %v513_v57  ;;  %v564_v16 = vrot.slane %v513_v57, 4  ;;  %v1012_v33 = vrot.slane %v961_v50, 4 }
  0xe7   : > { %v529_v39 = vsel %vm390_vm2, %v286_v48, %v528_v24  ;;  %v4246_v4 = vperm.slane %v527_v36, %v3942_v26  ;;  %v551_v49 = vsel %vm390_vm2, %v550_v29, %v509_v58  ;;  %v552_v55 = vrot.slane %v509_v58, 4 }
  0xe8   : > { %v4250_v27 = vperm.slane %v563_v28, %v3978_v5  ;;  %v4253_v20 = vperm.slane %v529_v39, %v3942_v26  ;;  %v4256_v37 = vperm.slane %v551_v49, %v3978_v5  ;;  %v565_v11 = vsel %vm390_vm2, %v525_v0, %v564_v16 }
  0xe9   : > { %v963_v48 = vsel %vm390_vm2, %v962_v54, %v3987_v10  ;;  %v1000_v57 = vrot.slane %v957_v6, 4  ;;  %v553_v29 = vsel %vm390_vm2, %v521_v34, %v552_v55  ;;  %v4263_v24 = vperm.slane %v565_v11, %v3978_v5 }
  0xea   : > { %v576_v58 = vrot.slane %v4246_v4, 4  ;;  %v608_v36 = vrot.slane %v4250_v27, 4  ;;  %v588_v28 = vrot.slane %v4253_v20, 4  ;;  %v965_v0 = vsel %vm390_vm2, %v270_v1, %v964_v43 }
  0xeb   : > { %v969_v16 = vperm.slane %v963_v48, %v3942_v26  ;;  %v4273_v54 = vperm.slane %v553_v29, %v3978_v5  ;;  %v973_v34 = vperm.slane %v965_v0, %v3942_v26  ;;  %v986_v39 = vrot.slane %v294_v21, 4 }
  0xec   : > { %v988_v49 = vrot.slane %v282_v51, 4  ;;  %v600_v55 = vrot.slane %v4256_v37, 4  ;;  %v612_v11 = vrot.slane %v4263_v24, 4  ;;  %v1386_v40 = vrot.slane %v4221_v23, 4 }
  0xed   : > { %v998_v47 = vrot.slane %v969_v16, 4  ;;  %v1001_v38 = vsel %vm390_vm2, %v969_v16, %v1000_v57  ;;  %v1010_v43 = vrot.slane %v973_v34, 4  ;;  %v1013_v1 = vsel %vm390_vm2, %v973_v34, %v1012_v33 }
  0xee   : > { %v4280_v10 = vperm.slane %v1001_v38, %v3978_v5  ;;  %v987_v48 = vsel %vm390_vm2, %v986_v39, %v282_v51  ;;  %v4286_v0 = vperm.slane %v1013_v1, %v3978_v5  ;;  %v989_v31 = vsel %vm390_vm2, %v294_v21, %v988_v49  ;;  %v4300_v51 = vpop.permute.xlu0 %279  ;;  %v306_v39 = vpop.permute.xlu2 %305 }
  0xef   : > { %v999_v29 = vsel %vm390_vm2, %v998_v47, %v957_v6  ;;  %v4290_v19 = vperm.slane %v987_v48, %v3942_v26  ;;  %v604_v57 = vrot.slane %v4273_v54, 4  ;;  %v1011_v16 = vsel %vm390_vm2, %v1010_v43, %v961_v50 }
  0xf0   : > { %v4294_v38 = vperm.slane %v999_v29, %v3978_v5  ;;  %v4298_v33 = vperm.slane %v989_v31, %v3942_v26  ;;  %v4303_v47 = vperm.slane %v1011_v16, %v3978_v5  ;;  %v540_v6 = vrot.slane %v4300_v51, 4 }
  0xf1   : > { %v616_v34 = vrot.slane %v3902_v13, 4  ;;  %v614_v50 = vrot.slane %v306_v39, 4  ;;  %v1335_v31 = vsel %vm390_vm2, %v1334_v42, %v4177_v18  ;;  %v1337_v29 = vsel %vm390_vm2, %v4171_v14, %v1336_v41 }
  0xf2   : > { %v1341_v16 = vperm.slane %v1335_v31, %v3978_v5  ;;  %v1034_v9 = vrot.slane %v4298_v33, 4  ;;  %v1345_v49 = vperm.slane %v1337_v29, %v3978_v5  ;;  %v1347_v42 = vsel %vm390_vm2, %v1346_v53, %v4185_v44 }
  0xf3   : > { %v617_v48 = vsel %vm390_vm2, %v306_v39, %v616_v34  ;;  %v615_v21 = vsel %vm390_vm2, %v614_v50, %v3902_v13  ;;  %v1349_v14 = vsel %vm390_vm2, %v4174_v22, %v1348_v32  ;;  %v1353_v18 = vperm.slane %v1347_v42, %v3978_v5 }
  0xf4   : > { %v4330_v34 = vperm.slane %v617_v48, %v3942_v26  ;;  %v1359_v13 = vsel %vm390_vm2, %v1358_v60, %v4188_v59  ;;  %v4342_v41 = vperm.slane %v615_v21, %v3942_v26  ;;  %v1357_v53 = vperm.slane %v1349_v14, %v3978_v5 }
  0xf5   : > { %v1365_v39 = vperm.slane %v1359_v13, %v3978_v5  ;;  %v1371_v44 = vsel %vm390_vm2, %v1370_v17, %v4197_v46  ;;  %v1384_v50 = vrot.slane %v1341_v16, 4  ;;  %v1388_v60 = vrot.slane %v1345_v49, 4 }
  0xf6   : > { %v1377_v32 = vperm.slane %v1371_v44, %v3978_v5  ;;  %v1392_v21 = vrot.slane %v1353_v18, 4  ;;  %v1394_v31 = vrot.slane %v4231_v15, 4  ;;  %v4356_v29 = vsel %vm390_vm2, %v1386_v40, %v1345_v49  ;;  %v292_v44 = vpop.permute.xlu1 %291 }
  0xf7   : > { %v1382_v59 = vrot.slane %v1365_v39, 4  ;;  %6587 = vst [vmem:[#allocation15_spill] sm:$0xff] %v4356_v29  ;;  %v1396_v42 = vrot.slane %v1357_v53, 4  ;;  %v4364_v14 = vsel %vm390_vm2, %v4221_v23, %v1388_v60  ;;  %v4370_v48 = vsel %vm390_vm2, %v1365_v39, %v1384_v50 }
  0xf8   : > { %v1390_v52 = vrot.slane %v1377_v32, 4  ;;  %6589 = vst [vmem:[#allocation17_spill] sm:$0xff] %v4364_v14  ;;  %v4367_v13 = vsel %vm390_vm2, %v1394_v31, %v1357_v53  ;;  %v2194_v23 = vrot.slane %v4364_v14, 4  ;;  %v538_v50 = vrot.slane %v292_v44, 4 }
  0xf9   : > { %v4360_v17 = vsel %vm390_vm2, %v1382_v59, %v1341_v16  ;;  %6590 = vst [vmem:[#allocation18_spill] sm:$0xff] %v4367_v13  ;;  %v4377_v40 = vsel %vm390_vm2, %v4231_v15, %v1396_v42  ;;  %v2182_v16 = vrot.slane %v4356_v29, 4  ;;  %v4381_v59 = vsel %vm390_vm2, %v1377_v32, %v1392_v21  ;;  %v4397_v42 = vpop.permute.xlu0 %287 }
  0xfa   : > { %6588 = vst [vmem:[#allocation16_spill] sm:$0xff] %v4360_v17  ;;  %v4373_v49 = vsel %vm390_vm2, %v1390_v52, %v1353_v18  ;;  %v2206_v53 = vrot.slane %v4367_v13, 4  ;;  %v2218_v60 = vrot.slane %v4377_v40, 4  ;;  %v541_v15 = vsel %vm390_vm2, %v292_v44, %v540_v6 }
  0xfb   : > { %6591 = vst [vmem:[#allocation19_spill] sm:$0xff] %v4370_v48  ;;  %v2183_v39 = vsel %vm390_vm2, %v2182_v16, %v4360_v17  ;;  %v2195_v31 = vsel %vm390_vm2, %v2194_v23, %v4370_v48  ;;  %v539_v44 = vsel %vm390_vm2, %v538_v50, %v4300_v51  ;;  %v549_v21 = vperm.slane %v541_v15, %v3942_v26 }
  0xfc   : > { %6592 = vst [vmem:[#allocation20_spill] sm:$0xff] %v4373_v49  ;;  %v2207_v32 = vsel %vm390_vm2, %v2206_v53, %v4373_v49  ;;  %v2219_v52 = vsel %vm390_vm2, %v2218_v60, %v4381_v59  ;;  %v4400_v16 = vperm.slane %v2195_v31, %v3942_v26  ;;  %v4409_v23 = vperm.slane %v2183_v39, %v3942_v26 }
  0xfd   : > { %6593 = vst [vmem:[#allocation21_spill] sm:$0xff] %v4377_v40  ;;  %v4404_v6 = vperm.slane %v2219_v52, %v3942_v26  ;;  %v4412_v53 = vperm.slane %v2207_v32, %v3942_v26  ;;  %v545_v60 = vperm.slane %v539_v44, %v3942_v26  ;;  %v974_v52 = vrot.slane %v4397_v42, 4 }
  0xfe   : > { %6594 = vst [vmem:[#allocation22_spill] sm:$0xff] %v4381_v59  ;;  %v2230_v31 = vrot.slane %v4400_v16, 4  ;;  %v977_v51 = vsel %vm390_vm2, %v4397_v42, %v976_v3  ;;  %v586_v32 = vrot.slane %v549_v21, 4  ;;  %v589_v15 = vsel %vm390_vm2, %v549_v21, %v588_v28 }
  0xff   : > { %v2254_v18 = vrot.slane %v4404_v6, 4  ;;  %v574_v39 = vrot.slane %v545_v60, 4  ;;  %v577_v50 = vsel %vm390_vm2, %v545_v60, %v576_v58  ;;  %v597_v3 = vperm.slane %v589_v15, %v3978_v5 }
 0x100   : > { %v2231_v44 = vsel %vm390_vm2, %v2230_v31, %v4409_v23  ;;  %v585_v43 = vperm.slane %v577_v50, %v3978_v5  ;;  %v587_v28 = vsel %vm390_vm2, %v586_v32, %v4253_v20  ;;  %v4448_v50 = vperm.slane %v977_v51, %v3942_v26 }
 0x101   : > { %v2255_v46 = vsel %vm390_vm2, %v2254_v18, %v4412_v53  ;;  %v4436_v22 = vperm.slane %v2231_v44, %v3978_v5  ;;  %v575_v60 = vsel %vm390_vm2, %v574_v39, %v4246_v4  ;;  %v593_v18 = vperm.slane %v587_v28, %v3978_v5 }
 0x102   : > { %v4439_v58 = vperm.slane %v2255_v46, %v3978_v5  ;;  %v581_v21 = vperm.slane %v575_v60, %v3978_v5  ;;  %v602_v31 = vrot.slane %v585_v43, 4  ;;  %v605_v46 = vsel %vm390_vm2, %v585_v43, %v604_v57 }
 0x103   : > { %v2280_v15 = vrot.slane %v4436_v22, 4  ;;  %v610_v44 = vrot.slane %v597_v3, 4  ;;  %v613_v4 = vsel %vm390_vm2, %v597_v3, %v612_v11  ;;  %v606_v32 = vrot.slane %v593_v18, 4 }
 0x104   : > { %v598_v20 = vrot.slane %v581_v21, 4  ;;  %v601_v39 = vsel %vm390_vm2, %v581_v21, %v600_v55  ;;  %v603_v51 = vsel %vm390_vm2, %v602_v31, %v4273_v54  ;;  %v609_v57 = vsel %vm390_vm2, %v593_v18, %v608_v36  ;;  %v4475_v36 = vpop.permute.xlu2 %313 }
 0x105   : > { %v2281_v60 = vsel %vm390_vm2, %v4439_v58, %v2280_v15  ;;  %v611_v43 = vsel %vm390_vm2, %v610_v44, %v4263_v24  ;;  %v1510_v11 = vrot.slane %v603_v51, 4  ;;  %v607_v54 = vsel %vm390_vm2, %v606_v32, %v4250_v27 }
 0x106   : > { %3082 = vrot.lane.b32.xlu0 %v2281_v60, %s3732_s22  ;;  %v599_v55 = vsel %vm390_vm2, %v598_v20, %v4256_v37  ;;  %v1522_v3 = vrot.slane %v605_v46, 4  ;;  %v1524_v28 = vrot.slane %v601_v39, 4  ;;  %v1534_v15 = vrot.slane %v611_v43, 4 }
 0x107   : > { %v1511_v21 = vsel %vm390_vm2, %v1510_v11, %v599_v55  ;;  %v1512_v31 = vrot.slane %v599_v55, 4  ;;  %v1536_v1 = vrot.slane %v607_v54, 4  ;;  %v1546_v37 = vrot.slane %v613_v4, 4 }
 0x108   : > { %v4478_v24 = vperm.slane %v1511_v21, %v3942_v26  ;;  %v1523_v18 = vsel %vm390_vm2, %v1522_v3, %v601_v39  ;;  %v1525_v44 = vsel %vm390_vm2, %v605_v46, %v1524_v28  ;;  %v1535_v60 = vsel %vm390_vm2, %v1534_v15, %v607_v54  ;;  %v4498_v3 = vpop.permute.xlu1 %301 }
 0x109   : > { %v1513_v20 = vsel %vm390_vm2, %v603_v51, %v1512_v31  ;;  %v4484_v27 = vperm.slane %v1523_v18, %v3942_v26  ;;  %v4487_v32 = vperm.slane %v1525_v44, %v3942_v26  ;;  %v1537_v55 = vsel %vm390_vm2, %v611_v43, %v1536_v1 }
 0x10a   : > { %v4491_v11 = vperm.slane %v1513_v20, %v3942_v26  ;;  %v4495_v39 = vperm.slane %v1535_v60, %v3942_v26  ;;  %v1547_v46 = vsel %vm390_vm2, %v1546_v37, %v609_v57  ;;  %v4502_v28 = vperm.slane %v1537_v55, %v3942_v26 }
 0x10b   : > { %v1548_v21 = vrot.slane %v609_v57, 4  ;;  %v1074_v54 = vrot.slane %v4475_v36, 4  ;;  %v4506_v31 = vperm.slane %v1547_v46, %v3942_v26  ;;  %v975_v57 = vsel %vm390_vm2, %v974_v52, %v4136_v45  ;;  %v4526_v46 = vpop.permute.xlu0 %299 }
 0x10c   : > { %v1584_v15 = vrot.slane %v4495_v39, 4  ;;  %v1596_v37 = vrot.slane %v4502_v28, 4  ;;  %v981_v55 = vperm.slane %v975_v57, %v3942_v26  ;;  %v1036_v42 = vrot.slane %v4448_v50, 4 }
 0x10d   : > { %v1549_v18 = vsel %vm390_vm2, %v613_v4, %v1548_v21  ;;  %v1035_v4 = vsel %vm390_vm2, %v1034_v9, %v4448_v50  ;;  %v1075_v52 = vsel %vm390_vm2, %v1074_v54, %v4498_v3  ;;  %v6595_v51 = vrot.slane %v4290_v19, 4  ;;  %v4547_v54 = vpop.permute.xlu2 %323 }
 0x10e   : > { %v1585_v60 = vsel %vm390_vm2, %v4506_v31, %v1584_v15  ;;  %v4529_v21 = vperm.slane %v1549_v18, %v3942_v26  ;;  %v1041_v45 = vperm.slane %v1035_v4, %v3978_v5  ;;  %v1024_v20 = vrot.slane %v981_v55, 4 }
 0x10f   : > { %v4537_v57 = vperm.slane %v1585_v60, %v3978_v5  ;;  %v1023_v9 = vsel %vm390_vm2, %v6595_v51, %v981_v55  ;;  %v1037_v4 = vsel %vm390_vm2, %v4298_v33, %v1036_v42  ;;  %v6596_v43 = vrot.slane %v4303_v47, 4 }
 0x110   : > { %v1597_v18 = vsel %vm390_vm2, %v4529_v21, %v1596_v37  ;;  %v1029_v50 = vperm.slane %v1023_v9, %v3978_v5  ;;  %v1054_v44 = vrot.slane %v1041_v45, 4  ;;  %v1025_v60 = vsel %vm390_vm2, %v4290_v19, %v1024_v20 }
 0x111   : > { %v1045_v15 = vperm.slane %v1037_v4, %v3978_v5  ;;  %v1057_v51 = vsel %vm390_vm2, %v1041_v45, %v6596_v43  ;;  %v1076_v55 = vrot.slane %v4498_v3, 4  ;;  %v1033_v37 = vperm.slane %v1025_v60, %v3978_v5  ;;  %v312_v43 = vpop.permute.xlu1 %311 }
 0x112   : > { %v1046_v9 = vrot.slane %v1029_v50, 4  ;;  %v6597_v1 = vrot.slane %v4294_v38, 4  ;;  %v1055_v42 = vsel %vm390_vm2, %v1054_v44, %v4303_v47  ;;  %v6598_v19 = vrot.slane %v4286_v0, 4 }
 0x113   : > { %v1058_v35 = vrot.slane %v1045_v15, 4  ;;  %v1648_v30 = vrot.slane %v1055_v42, 4  ;;  %v1050_v45 = vrot.slane %v1033_v37, 4  ;;  %v6599_v60 = vrot.slane %v4280_v10, 4 }
 0x114   : > { %v1049_v33 = vsel %vm390_vm2, %v1029_v50, %v6597_v1  ;;  %v1061_v20 = vsel %vm390_vm2, %v1045_v15, %v6598_v19  ;;  %v1047_v3 = vsel %vm390_vm2, %v1046_v9, %v4294_v38 }
 0x115   : > { %v1636_v4 = vrot.slane %v1049_v33, 4  ;;  %v1053_v2 = vsel %vm390_vm2, %v1033_v37, %v6599_v60  ;;  %v1658_v1 = vrot.slane %v1061_v20, 4  ;;  %v1059_v47 = vsel %vm390_vm2, %v1058_v35, %v4286_v0  ;;  %v308_v0 = vpop.permute.xlu0 %307 }
 0x116   : > { %v1624_v44 = vrot.slane %v1047_v3, 4  ;;  %v1634_v50 = vrot.slane %v1053_v2, 4  ;;  %v1051_v15 = vsel %vm390_vm2, %v1050_v45, %v4280_v10  ;;  %v1646_v38 = vrot.slane %v1059_v47, 4 }
 0x117   : > { %v1637_v8 = vsel %vm390_vm2, %v1053_v2, %v1636_v4  ;;  %v1649_v9 = vsel %vm390_vm2, %v1059_v47, %v1648_v30  ;;  %v1622_v63 = vrot.slane %v1051_v15, 4  ;;  %v1659_v4 = vsel %vm390_vm2, %v1658_v1, %v1057_v51  ;;  %v332_v1 = vpop.permute.xlu2 %331 }
 0x118   : > { %v4576_v19 = vperm.slane %v1637_v8, %v3942_v26  ;;  %v1625_v37 = vsel %vm390_vm2, %v1051_v15, %v1624_v44  ;;  %v1635_v60 = vsel %vm390_vm2, %v1634_v50, %v1049_v33  ;;  %v4582_v35 = vperm.slane %v1649_v9, %v3942_v26 }
 0x119   : > { %v4585_v2 = vperm.slane %v1625_v37, %v3942_v26  ;;  %v4588_v10 = vperm.slane %v1635_v60, %v3942_v26  ;;  %v1647_v8 = vsel %vm390_vm2, %v1646_v38, %v1055_v42  ;;  %v1623_v30 = vsel %vm390_vm2, %v1622_v63, %v1047_v3 }
 0x11a   : > { %6600 = vst [vmem:[#allocation23_spill] sm:$0xff] %v4576_v19  ;;  %v4594_v45 = vperm.slane %v1647_v8, %v3942_v26  ;;  %v1660_v33 = vrot.slane %v1057_v51, 4  ;;  %v4597_v47 = vperm.slane %v1659_v4, %v3942_v26  ;;  %v4601_v50 = vperm.slane %v1597_v18, %v3978_v5 }
 0x11b   : > { %6601 = vst [vmem:[#allocation24_spill] sm:$0xff] %v4582_v35  ;;  %v4604_v15 = vperm.slane %v1623_v30, %v3942_v26  ;;  %v1708_v38 = vrot.slane %v4582_v35, 4  ;;  %v1077_v37 = vsel %vm390_vm2, %v4475_v36, %v1076_v55  ;;  %v1081_v60 = vperm.slane %v1075_v52, %v3942_v26 }
 0x11c   : > { %6602 = vst [vmem:[#allocation25_spill] sm:$0xff] %v4585_v2  ;;  %v1661_v63 = vsel %vm390_vm2, %v1061_v20, %v1660_v33  ;;  %v1696_v51 = vrot.slane %v4594_v45, 4  ;;  %v1085_v4 = vperm.slane %v1077_v37, %v3942_v26  ;;  %v628_v30 = vrot.slane %v4526_v46, 4  ;;  %v320_v33 = vpop.permute.xlu1 %319 }
 0x11d   : > { %6603 = vst [vmem:[#allocation26_spill] sm:$0xff] %v4588_v10  ;;  %v4612_v9 = vperm.slane %v1661_v63, %v3942_v26  ;;  %v1110_v8 = vrot.slane %v1081_v60, 4  ;;  %v626_v18 = vrot.slane %v312_v43, 4  ;;  %v1064_v42 = vrot.slane %v3900_v12, 4  ;;  %v318_v62 = vpop.permute.xlu0 %317 }
 0x11e   : > { %6604 = vst [vmem:[#allocation27_spill] sm:$0xff] %v4594_v45  ;;  %v1697_v20 = vsel %vm390_vm2, %v4597_v47, %v1696_v51  ;;  %v629_v51 = vsel %vm390_vm2, %v312_v43, %v628_v30  ;;  %v1062_v44 = vrot.slane %v308_v0, 4  ;;  %v1086_v63 = vrot.slane %v332_v1, 4 }
 0x11f   : > { %6605 = vst [vmem:[#allocation28_spill] sm:$0xff] %v4597_v47  ;;  %v4625_v3 = vperm.slane %v1697_v20, %v3978_v5  ;;  %v1709_v36 = vsel %vm390_vm2, %v4612_v9, %v1708_v38  ;;  %v637_v37 = vperm.slane %v629_v51, %v3942_v26  ;;  %v1122_v25 = vrot.slane %v1085_v4, 4 }
 0x120   : > { %6606 = vst [vmem:[#allocation29_spill] sm:$0xff] %v4604_v15  ;;  %v4635_v20 = vperm.slane %v1709_v36, %v3978_v5  ;;  %v627_v38 = vsel %vm390_vm2, %v626_v18, %v4526_v46  ;;  %v1088_v52 = vrot.slane %v320_v33, 4  ;;  %v6610_v43 = vrot.slane %v4330_v34, 4 }
 0x121   : > { %6607 = vst [vmem:[#allocation30_spill] sm:$0xff] %v4612_v9  ;;  %v633_v55 = vperm.slane %v627_v38, %v3942_v26  ;;  %v674_v7 = vrot.slane %v637_v37, 4  ;;  %v1063_v51 = vsel %vm390_vm2, %v1062_v44, %v3900_v12  ;;  %v1065_v36 = vsel %vm390_vm2, %v308_v0, %v1064_v42  ;;  %v4657_v12 = vpop.permute.xlu2 %341 }
 0x122   : > { %6608 = vst [vmem:[#allocation31_spill] sm:$0xff] %v4625_v3  ;;  %v677_v30 = vsel %vm390_vm2, %v637_v37, %v6610_v43  ;;  %v1069_v61 = vperm.slane %v1063_v51, %v3942_v26  ;;  %v1087_v46 = vsel %vm390_vm2, %v1086_v63, %v320_v33  ;;  %v6611_v38 = vrot.slane %v4342_v41, 4 }
 0x123   : > { %6609 = vst [vmem:[#allocation32_spill] sm:$0xff] %v4635_v20  ;;  %v4646_v56 = vperm.slane %v677_v30, %v3978_v5  ;;  %v662_v18 = vrot.slane %v633_v55, 4  ;;  %v675_v37 = vsel %vm390_vm2, %v674_v7, %v4330_v34  ;;  %v1073_v43 = vperm.slane %v1065_v36, %v3942_v26 }
 0x124   : > { %v665_v20 = vsel %vm390_vm2, %v633_v55, %v6611_v38  ;;  %v4663_v0 = vperm.slane %v675_v37, %v3978_v5  ;;  %v1111_v42 = vsel %vm390_vm2, %v1110_v8, %v1069_v61  ;;  %v640_v33 = vrot.slane %v318_v62, 4  ;;  %v330_v38 = vpop.permute.xlu1 %329 }
 0x125   : > { %v4660_v44 = vperm.slane %v665_v20, %v3978_v5  ;;  %v663_v63 = vsel %vm390_vm2, %v662_v18, %v4342_v41  ;;  %v1112_v55 = vrot.slane %v1069_v61, 4  ;;  %v4669_v30 = vperm.slane %v1111_v42, %v3978_v5 }
 0x126   : > { %v1123_v7 = vsel %vm390_vm2, %v1122_v25, %v1073_v43  ;;  %v4673_v34 = vperm.slane %v663_v63, %v3978_v5  ;;  %v1124_v51 = vrot.slane %v1073_v43, 4  ;;  %v1089_v41 = vsel %vm390_vm2, %v332_v1, %v1088_v52 }
 0x127   : > { %v1113_v37 = vsel %vm390_vm2, %v1081_v60, %v1112_v55  ;;  %v4680_v61 = vperm.slane %v1123_v7, %v3978_v5  ;;  %v4689_v43 = vperm.slane %v1087_v46, %v3942_v26  ;;  %v4696_v55 = vperm.slane %v1089_v41, %v3942_v26 }
 0x128   : > { %v4685_v18 = vperm.slane %v1113_v37, %v3978_v5  ;;  %v1125_v42 = vsel %vm390_vm2, %v1085_v4, %v1124_v51  ;;  %v638_v7 = vrot.slane %v330_v38, 4  ;;  %v641_v4 = vsel %vm390_vm2, %v330_v38, %v640_v33  ;;  %v326_v51 = vpop.permute.xlu0 %325 }
 0x129   : > { %v4692_v63 = vperm.slane %v1125_v42, %v3978_v5  ;;  %v1100_v20 = vrot.slane %v326_v51, 4  ;;  %v1148_v41 = vrot.slane %v4696_v55, 4  ;;  %v4707_v8 = vperm.slane %v641_v4, %v3942_v26 }
 0x12a   : > { %v639_v36 = vsel %vm390_vm2, %v638_v7, %v318_v62  ;;  %v6612_v1 = vrot.slane %v4484_v27, 4  ;;  %v6613_v33 = vrot.slane %v4478_v24, 4  ;;  %v4720_v62 = vpop.permute.xlu2 %349  ;;  %v6614_v60 = vrot.slane %v4487_v32, 4 }
 0x12b   : > { %v4718_v46 = vperm.slane %v639_v36, %v3942_v26  ;;  %v6626_v2 = vrot.slane %v4669_v30, 4 }
 0x12c   : > { %v1559_v25 = vsel %vm390_vm2, %v6612_v1, %v4478_v24  ;;  %v1561_v38 = vsel %vm390_vm2, %v4484_v27, %v6613_v33  ;;  %v1571_v37 = vsel %vm390_vm2, %v6614_v60, %v4491_v11  ;;  %v6615_v24 = vrot.slane %v4491_v11, 4 }
 0x12d   : > { %v1565_v7 = vperm.slane %v1559_v25, %v3978_v5  ;;  %v1569_v4 = vperm.slane %v1561_v38, %v3978_v5  ;;  %v1577_v36 = vperm.slane %v1571_v37, %v3978_v5  ;;  %v6616_v33 = vrot.slane %v4506_v31, 4 }
 0x12e   : > { %v1573_v27 = vsel %vm390_vm2, %v4487_v32, %v6615_v24  ;;  %v6617_v60 = vrot.slane %v4529_v21, 4  ;;  %v1610_v32 = vrot.slane %v4537_v57, 4 }
 0x12f   : > { %v1583_v25 = vsel %vm390_vm2, %v6616_v33, %v4495_v39  ;;  %v1581_v38 = vperm.slane %v1573_v27, %v3978_v5  ;;  %v1608_v11 = vrot.slane %v1565_v7, 4  ;;  %v1612_v37 = vrot.slane %v1569_v4, 4 }
 0x130   : > { %v1589_v52 = vperm.slane %v1583_v25, %v3978_v5  ;;  %v1595_v1 = vsel %vm390_vm2, %v6617_v60, %v4502_v28  ;;  %v1616_v24 = vrot.slane %v1577_v36, 4  ;;  %v1618_v39 = vrot.slane %v4601_v50, 4 }
 0x131   : > { %v1601_v42 = vperm.slane %v1595_v1, %v3978_v5  ;;  %v1620_v27 = vrot.slane %v1581_v38, 4  ;;  %v4752_v21 = vsel %vm390_vm2, %v1610_v32, %v1569_v4  ;;  %v4756_v28 = vsel %vm390_vm2, %v4537_v57, %v1612_v37  ;;  %v4794_v4 = vpop.permute.xlu0 %335 }
 0x132   : > { %v1606_v3 = vrot.slane %v1589_v52, 4  ;;  %v4749_v33 = vsel %vm390_vm2, %v1589_v52, %v1608_v11  ;;  %v4762_v60 = vsel %vm390_vm2, %v1618_v39, %v1581_v38  ;;  %v2294_v52 = vrot.slane %v4752_v21, 4  ;;  %v338_v11 = vpop.permute.xlu1 %337 }
 0x133   : > { %v1614_v1 = vrot.slane %v1601_v42, 4  ;;  %v4766_v31 = vsel %vm390_vm2, %v4601_v50, %v1620_v27  ;;  %v4774_v57 = vsel %vm390_vm2, %v1601_v42, %v1616_v24  ;;  %v2318_v50 = vrot.slane %v4762_v60, 4 }
 0x134   : > { %v4759_v25 = vsel %vm390_vm2, %v1606_v3, %v1565_v7  ;;  %6618 = vst [vmem:[#allocation33_spill] sm:$0xff] %v4766_v31  ;;  %v2306_v3 = vrot.slane %v4756_v28, 4  ;;  %v2330_v37 = vrot.slane %v4766_v31, 4  ;;  %v1098_v42 = vrot.slane %v338_v11, 4 }
 0x135   : > { %v4771_v32 = vsel %vm390_vm2, %v1614_v1, %v1577_v36  ;;  %6619 = vst [vmem:[#allocation34_spill] sm:$0xff] %v4774_v57  ;;  %v2295_v7 = vsel %vm390_vm2, %v2294_v52, %v4759_v25  ;;  %v1101_v38 = vsel %vm390_vm2, %v338_v11, %v1100_v20 }
 0x136   : > { %v2307_v39 = vsel %vm390_vm2, %v2306_v3, %v4749_v33  ;;  %v2319_v1 = vsel %vm390_vm2, %v2318_v50, %v4771_v32  ;;  %v2331_v52 = vsel %vm390_vm2, %v2330_v37, %v4774_v57  ;;  %v4797_v3 = vperm.slane %v2295_v7, %v3942_v26 }
 0x137   : > { %v4787_v24 = vperm.slane %v2307_v39, %v3942_v26  ;;  %v4800_v36 = vperm.slane %v2331_v52, %v3942_v26  ;;  %v1099_v27 = vsel %vm390_vm2, %v1098_v42, %v326_v51  ;;  %v1109_v39 = vperm.slane %v1101_v38, %v3942_v26 }
 0x138   : > { %v4805_v9 = vperm.slane %v2319_v1, %v3942_v26  ;;  %v1105_v20 = vperm.slane %v1099_v27, %v3942_v26  ;;  %v6620_v42 = vrot.slane %v4689_v43, 4 }
 0x139   : > { %v2342_v37 = vrot.slane %v4787_v24, 4  ;;  %v2366_v11 = vrot.slane %v4800_v36, 4  ;;  %v1146_v7 = vrot.slane %v1109_v39, 4  ;;  %v1149_v35 = vsel %vm390_vm2, %v1109_v39, %v1148_v41 }
 0x13a   : > { %v1134_v38 = vrot.slane %v1105_v20, 4  ;;  %v1137_v1 = vsel %vm390_vm2, %v1105_v20, %v6620_v42  ;;  %v1157_v50 = vperm.slane %v1149_v35, %v3978_v5 }
 0x13b   : > { %v2343_v51 = vsel %vm390_vm2, %v2342_v37, %v4797_v3  ;;  %v2367_v27 = vsel %vm390_vm2, %v2366_v11, %v4805_v9  ;;  %v1145_v41 = vperm.slane %v1137_v1, %v3978_v5  ;;  %v1147_v39 = vsel %vm390_vm2, %v1146_v7, %v4696_v55 }
 0x13c   : > { %v4820_v47 = vperm.slane %v2343_v51, %v3978_v5  ;;  %v4828_v37 = vperm.slane %v2367_v27, %v3978_v5  ;;  %v1135_v52 = vsel %vm390_vm2, %v1134_v38, %v4689_v43  ;;  %v1153_v20 = vperm.slane %v1147_v39, %v3978_v5 }
 0x13d   : > { %v1170_v35 = vrot.slane %v1157_v50, 4  ;;  %v1141_v42 = vperm.slane %v1135_v52, %v3978_v5  ;;  %v1162_v45 = vrot.slane %v1145_v41, 4  ;;  %v6623_v11 = vrot.slane %v4685_v18, 4 }
 0x13e   : > { %6621 = vst [vmem:[#allocation35_spill] sm:$0xff] %v4820_v47  ;;  %v2392_v51 = vrot.slane %v4820_v47, 4  ;;  %v1166_v19 = vrot.slane %v1153_v20, 4  ;;  %v6624_v55 = vrot.slane %v4680_v61, 4  ;;  %v6625_v38 = vrot.slane %v4547_v54, 4 }
 0x13f   : > { %6622 = vst [vmem:[#allocation36_spill] sm:$0xff] %v4828_v37  ;;  %v1165_v1 = vsel %vm390_vm2, %v1145_v41, %v6623_v11  ;;  %v1171_v43 = vsel %vm390_vm2, %v1170_v35, %v4692_v63  ;;  %v1158_v39 = vrot.slane %v1141_v42, 4  ;;  %v1161_v41 = vsel %vm390_vm2, %v1141_v42, %v6626_v2 }
 0x140   : > { %v1169_v7 = vsel %vm390_vm2, %v1153_v20, %v6624_v55  ;;  %v653_v27 = vsel %vm390_vm2, %v4794_v4, %v6625_v38  ;;  %v2393_v52 = vsel %vm390_vm2, %v4828_v37, %v2392_v51  ;;  %v1163_v11 = vsel %vm390_vm2, %v1162_v45, %v4685_v18 }
 0x141   : > { %3084 = vrot.lane.b32.xlu1 %v2393_v52, %s3732_s22  ;;  %v1167_v20 = vsel %vm390_vm2, %v1166_v19, %v4680_v61  ;;  %v6627_v35 = vrot.slane %v4692_v63, 4  ;;  %v1846_v38 = vrot.slane %v1163_v11, 4  ;;  %v1858_v10 = vrot.slane %v1165_v1, 4 }
 0x142   : > { %v1159_v51 = vsel %vm390_vm2, %v1158_v39, %v4669_v30  ;;  %v1860_v15 = vrot.slane %v1161_v41, 4  ;;  %v1870_v47 = vrot.slane %v1171_v43, 4  ;;  %v1872_v2 = vrot.slane %v1167_v20, 4 }
 0x143   : > { %v1173_v55 = vsel %vm390_vm2, %v1157_v50, %v6627_v35  ;;  %v1847_v42 = vsel %vm390_vm2, %v1846_v38, %v1159_v51  ;;  %v1848_v45 = vrot.slane %v1159_v51, 4  ;;  %v1859_v18 = vsel %vm390_vm2, %v1858_v10, %v1161_v41  ;;  %v4895_v51 = vpop.permute.xlu1 %347 }
 0x144   : > { %v1882_v52 = vrot.slane %v1173_v55, 4  ;;  %v1861_v19 = vsel %vm390_vm2, %v1165_v1, %v1860_v15  ;;  %v4866_v61 = vperm.slane %v1859_v18, %v3942_v26  ;;  %v1871_v63 = vsel %vm390_vm2, %v1870_v47, %v1167_v20 }
 0x145   : > { %v661_v50 = vperm.slane %v653_v27, %v3942_v26  ;;  %v1849_v30 = vsel %vm390_vm2, %v1163_v11, %v1848_v45  ;;  %v4872_v39 = vperm.slane %v1847_v42, %v3942_v26  ;;  %v1873_v35 = vsel %vm390_vm2, %v1171_v43, %v1872_v2  ;;  %v4885_v27 = vpop.permute.xlu2 %359 }
 0x146   : > { %6628 = vst [vmem:[#allocation37_spill] sm:$0xff] %v4866_v61  ;;  %v4876_v38 = vperm.slane %v1871_v63, %v3942_v26  ;;  %v4879_v10 = vperm.slane %v1849_v30, %v3942_v26  ;;  %v4882_v15 = vperm.slane %v1873_v35, %v3942_v26  ;;  %v1883_v47 = vsel %vm390_vm2, %v1882_v52, %v1169_v7 }
 0x147   : > { %6629 = vst [vmem:[#allocation38_spill] sm:$0xff] %v4872_v39  ;;  %v1884_v1 = vrot.slane %v1169_v7, 4  ;;  %v4889_v11 = vperm.slane %v1861_v19, %v3942_v26  ;;  %v4892_v43 = vperm.slane %v1883_v47, %v3942_v26  ;;  %v6636_v19 = vrot.slane %v4794_v4, 4 }
 0x148   : > { %6630 = vst [vmem:[#allocation39_spill] sm:$0xff] %v4876_v38  ;;  %v1908_v42 = vrot.slane %v4879_v10, 4  ;;  %v1920_v7 = vrot.slane %v4876_v38, 4  ;;  %v1932_v45 = vrot.slane %v4882_v15, 4  ;;  %v698_v30 = vrot.slane %v661_v50, 4 }
 0x149   : > { %6631 = vst [vmem:[#allocation40_spill] sm:$0xff] %v4879_v10  ;;  %v1885_v2 = vsel %vm390_vm2, %v1173_v55, %v1884_v1  ;;  %v651_v63 = vsel %vm390_vm2, %v6636_v19, %v4547_v54  ;;  %v6638_v1 = vrot.slane %v4707_v8, 4  ;;  %v6642_v41 = vrot.slane %v4663_v0, 4 }
 0x14a   : > { %6632 = vst [vmem:[#allocation41_spill] sm:$0xff] %v4882_v15  ;;  %v4902_v18 = vperm.slane %v1885_v2, %v3942_v26  ;;  %v1909_v55 = vsel %vm390_vm2, %v4889_v11, %v1908_v42  ;;  %v4913_v35 = vsel %vm390_vm2, %v4892_v43, %v1920_v7  ;;  %v657_v47 = vperm.slane %v651_v63, %v3942_v26 }
 0x14b   : > { %6633 = vst [vmem:[#allocation42_spill] sm:$0xff] %v4889_v11  ;;  %v701_v2 = vsel %vm390_vm2, %v661_v50, %v6638_v1  ;;  %v699_v42 = vsel %vm390_vm2, %v698_v30, %v4707_v8  ;;  %v4926_v19 = vperm.slane %v1909_v55, %v3978_v5  ;;  %v6640_v63 = vrot.slane %v4718_v46, 4  ;;  %v4938_v8 = vpop.permute.xlu0 %343 }
 0x14c   : > { %6634 = vst [vmem:[#allocation43_spill] sm:$0xff] %v4892_v43  ;;  %v1933_v54 = vsel %vm390_vm2, %v4902_v18, %v1932_v45  ;;  %v686_v7 = vrot.slane %v657_v47, 4  ;;  %v705_v50 = vperm.slane %v699_v42, %v3978_v5  ;;  %v709_v52 = vperm.slane %v701_v2, %v3978_v5 }
 0x14d   : > { %6635 = vst [vmem:[#allocation44_spill] sm:$0xff] %v4902_v18  ;;  %v689_v20 = vsel %vm390_vm2, %v657_v47, %v6640_v63  ;;  %v4934_v4 = vperm.slane %v1933_v54, %v3978_v5  ;;  %v2232_v42 = vrot.slane %v4409_v23, 4  ;;  %v6643_v1 = vrot.slane %v4660_v44, 4 }
 0x14e   : > { %6637 = vst [vmem:[#allocation45_spill] sm:$0xff] %v4913_v35  ;;  %v697_v45 = vperm.slane %v689_v20, %v3978_v5  ;;  %v687_v30 = vsel %vm390_vm2, %v686_v7, %v4718_v46  ;;  %v718_v55 = vrot.slane %v705_v50, 4  ;;  %v721_v47 = vsel %vm390_vm2, %v705_v50, %v6642_v41  ;;  %v4955_v41 = vpop.permute.xlu2 %367 }
 0x14f   : > { %6639 = vst [vmem:[#allocation46_spill] sm:$0xff] %v4926_v19  ;;  %v693_v63 = vperm.slane %v687_v30, %v3978_v5  ;;  %v722_v2 = vrot.slane %v709_v52, 4  ;;  %v6644_v46 = vrot.slane %v4646_v56, 4  ;;  %v1772_v15 = vrot.slane %v721_v47, 4 }
 0x150   : > { %6641 = vst [vmem:[#allocation47_spill] sm:$0xff] %v4934_v4  ;;  %v714_v54 = vrot.slane %v697_v45, 4  ;;  %v717_v20 = vsel %vm390_vm2, %v697_v45, %v6643_v1  ;;  %v719_v19 = vsel %vm390_vm2, %v718_v55, %v4663_v0  ;;  %v6645_v50 = vrot.slane %v4673_v34, 4  ;;  %v356_v0 = vpop.permute.xlu1 %355 }
 0x151   : > { %v725_v7 = vsel %vm390_vm2, %v709_v52, %v6644_v46  ;;  %v1746_v18 = vrot.slane %v717_v20, 4  ;;  %v710_v23 = vrot.slane %v693_v63, 4  ;;  %v723_v45 = vsel %vm390_vm2, %v722_v2, %v4646_v56 }
 0x152   : > { %v713_v30 = vsel %vm390_vm2, %v693_v63, %v6645_v50  ;;  %v715_v1 = vsel %vm390_vm2, %v714_v54, %v4660_v44  ;;  %v1758_v46 = vrot.slane %v723_v45, 4  ;;  %v1760_v11 = vrot.slane %v719_v19, 4 }
 0x153   : > { %v1734_v55 = vrot.slane %v715_v1, 4  ;;  %v1747_v35 = vsel %vm390_vm2, %v1746_v18, %v713_v30  ;;  %v1748_v52 = vrot.slane %v713_v30, 4  ;;  %v711_v43 = vsel %vm390_vm2, %v710_v23, %v4673_v34 }
 0x154   : > { %v4968_v38 = vperm.slane %v1747_v35, %v3942_v26  ;;  %v1770_v63 = vrot.slane %v725_v7, 4  ;;  %v1736_v44 = vrot.slane %v711_v43, 4  ;;  %v1759_v56 = vsel %vm390_vm2, %v1758_v46, %v719_v19 }
 0x155   : > { %v1735_v50 = vsel %vm390_vm2, %v1734_v55, %v711_v43  ;;  %v1749_v54 = vsel %vm390_vm2, %v717_v20, %v1748_v52  ;;  %v1761_v34 = vsel %vm390_vm2, %v723_v45, %v1760_v11  ;;  %v4981_v35 = vperm.slane %v1759_v56, %v3942_v26  ;;  %v354_v52 = vpop.permute.xlu0 %353 }
 0x156   : > { %v4974_v2 = vperm.slane %v1735_v50, %v3942_v26  ;;  %v4977_v18 = vperm.slane %v1749_v54, %v3942_v26  ;;  %v1737_v23 = vsel %vm390_vm2, %v715_v1, %v1736_v44  ;;  %v4985_v30 = vperm.slane %v1761_v34, %v3942_v26 }
 0x157   : > { %v1771_v43 = vsel %vm390_vm2, %v1770_v63, %v721_v47  ;;  %v1773_v19 = vsel %vm390_vm2, %v725_v7, %v1772_v15  ;;  %v4990_v20 = vperm.slane %v1737_v23, %v3942_v26  ;;  %v738_v45 = vrot.slane %v4885_v27, 4 }
 0x158   : > { %v4993_v55 = vperm.slane %v1771_v43, %v3942_v26  ;;  %v4996_v11 = vperm.slane %v1773_v19, %v3942_v26  ;;  %v1808_v47 = vrot.slane %v4981_v35, 4  ;;  %v1820_v15 = vrot.slane %v4985_v30, 4  ;;  %v378_v43 = vpop.permute.xlu2 %377 }
 0x159   : > { %v2233_v44 = vsel %vm390_vm2, %v4400_v16, %v2232_v42  ;;  %v2256_v23 = vrot.slane %v4412_v53, 4  ;;  %v739_v50 = vsel %vm390_vm2, %v738_v45, %v4895_v51  ;;  %v740_v16 = vrot.slane %v4895_v51, 4  ;;  %v366_v42 = vpop.permute.xlu1 %365 }
 0x15a   : > { %v1809_v56 = vsel %vm390_vm2, %v4993_v55, %v1808_v47  ;;  %v1821_v19 = vsel %vm390_vm2, %v4996_v11, %v1820_v15  ;;  %v5016_v1 = vperm.slane %v2233_v44, %v3978_v5  ;;  %v745_v53 = vperm.slane %v739_v50, %v3942_v26 }
 0x15b   : > { %v5022_v54 = vperm.slane %v1809_v56, %v3978_v5  ;;  %v2257_v47 = vsel %vm390_vm2, %v4404_v6, %v2256_v23  ;;  %v1176_v34 = vrot.slane %v4938_v8, 4  ;;  %v741_v44 = vsel %vm390_vm2, %v4885_v27, %v740_v16 }
 0x15c   : > { %v5029_v15 = vperm.slane %v2257_v47, %v3978_v5  ;;  %v1174_v45 = vrot.slane %v356_v0, 4  ;;  %v726_v63 = vrot.slane %v354_v52, 4  ;;  %v5034_v51 = vperm.slane %v1821_v19, %v3978_v5 }
 0x15d   : > { %v749_v56 = vperm.slane %v741_v44, %v3942_v26  ;;  %v1177_v7 = vsel %vm390_vm2, %v356_v0, %v1176_v34  ;;  %v6646_v6 = vrot.slane %v4657_v12, 4  ;;  %v774_v47 = vrot.slane %v745_v53, 4  ;;  %v362_v10 = vpop.permute.xlu0 %361 }
 0x15e   : > { %v2282_v23 = vrot.slane %v5029_v15, 4  ;;  %v1175_v46 = vsel %vm390_vm2, %v1174_v45, %v4938_v8  ;;  %v727_v27 = vsel %vm390_vm2, %v726_v63, %v4657_v12  ;;  %v1185_v19 = vperm.slane %v1177_v7, %v3942_v26 }
 0x15f   : > { %v729_v50 = vsel %vm390_vm2, %v354_v52, %v6646_v6  ;;  %v786_v16 = vrot.slane %v749_v56, 4  ;;  %v733_v44 = vperm.slane %v727_v27, %v3942_v26  ;;  %v1181_v52 = vperm.slane %v1175_v46, %v3942_v26 }
 0x160   : > { %v737_v0 = vperm.slane %v729_v50, %v3942_v26  ;;  %v2283_v34 = vsel %vm390_vm2, %v2282_v23, %v5016_v1  ;;  %v750_v6 = vrot.slane %v378_v43, 4  ;;  %v752_v4 = vrot.slane %v366_v42, 4 }
 0x161   : > { %3098 = vrot.lane.b32.xlu1 %v2283_v34, %s3731_s21  ;;  %v775_v12 = vsel %vm390_vm2, %v774_v47, %v733_v44  ;;  %v776_v63 = vrot.slane %v733_v44, 4  ;;  %v1186_v47 = vrot.slane %v362_v10, 4  ;;  %v386_v44 = vpop.permute.xlu2 %385  ;;  %v1224_v61 = vrot.slane %v1181_v52, 4 }
 0x162   : > { %v787_v7 = vsel %vm390_vm2, %v786_v16, %v737_v0  ;;  %v5057_v45 = vperm.slane %v775_v12, %v3978_v5  ;;  %v788_v50 = vrot.slane %v737_v0, 4  ;;  %v751_v46 = vsel %vm390_vm2, %v750_v6, %v366_v42 }
 0x163   : > { %v5060_v23 = vperm.slane %v787_v7, %v3978_v5  ;;  %v777_v27 = vsel %vm390_vm2, %v745_v53, %v776_v63  ;;  %v753_v34 = vsel %vm390_vm2, %v378_v43, %v752_v4  ;;  %v5066_v8 = vperm.slane %v751_v46, %v3942_v26  ;;  %v374_v7 = vpop.permute.xlu1 %373 }
 0x164   : > { %v1236_v16 = vrot.slane %v1185_v19, 4  ;;  %v5069_v12 = vperm.slane %v777_v27, %v3978_v5  ;;  %v789_v0 = vsel %vm390_vm2, %v749_v56, %v788_v50  ;;  %v1187_v43 = vsel %vm390_vm2, %v1186_v47, %v4720_v62 }
 0x165   : > { %v5073_v39 = vperm.slane %v789_v0, %v3978_v5  ;;  %v5080_v53 = vperm.slane %v753_v34, %v3942_v26  ;;  %v6647_v6 = vrot.slane %v4720_v62, 4  ;;  %v1193_v56 = vperm.slane %v1187_v43, %v3942_v26 }
 0x166   : > { %v1210_v50 = vrot.slane %v386_v44, 4  ;;  %v1212_v4 = vrot.slane %v374_v7, 4  ;;  %v6655_v59 = vrot.slane %v4955_v41, 4 }
 0x167   : > { %v1189_v63 = vsel %vm390_vm2, %v362_v10, %v6647_v6  ;;  %v1222_v47 = vrot.slane %v1193_v56, 4  ;;  %v1225_v34 = vsel %vm390_vm2, %v1193_v56, %v1224_v61 }
 0x168   : > { %v1197_v0 = vperm.slane %v1189_v63, %v3942_v26  ;;  %v1211_v37 = vsel %vm390_vm2, %v1210_v50, %v374_v7  ;;  %v5093_v62 = vperm.slane %v1225_v34, %v3978_v5  ;;  %v1213_v6 = vsel %vm390_vm2, %v386_v44, %v1212_v4  ;;  %v372_v7 = vpop.permute.xlu0 %371 }
 0x169   : > { %v1223_v46 = vsel %vm390_vm2, %v1222_v47, %v1181_v52  ;;  %v5102_v42 = vperm.slane %v1211_v37, %v3942_v26  ;;  %v5105_v61 = vperm.slane %v1213_v6, %v3942_v26  ;;  %v764_v34 = vrot.slane %v372_v7, 4 }
 0x16a   : > { %v1234_v10 = vrot.slane %v1197_v0, 4  ;;  %v1237_v43 = vsel %vm390_vm2, %v1197_v0, %v1236_v16  ;;  %v6648_v44 = vrot.slane %v4968_v38, 4  ;;  %v5114_v16 = vperm.slane %v1223_v46, %v3978_v5 }
 0x16b   : > { %v5099_v63 = vperm.slane %v1237_v43, %v3978_v5  ;;  %v6650_v46 = vrot.slane %v4977_v18, 4  ;;  %v6651_v0 = vrot.slane %v4990_v20, 4  ;;  %v384_v47 = vpop.permute.xlu1 %383 }
 0x16c   : > { %v1235_v50 = vsel %vm390_vm2, %v1234_v10, %v1185_v19  ;;  %v1783_v52 = vsel %vm390_vm2, %v6648_v44, %v4974_v2  ;;  %v6649_v19 = vrot.slane %v4974_v2, 4 }
 0x16d   : > { %v5117_v37 = vperm.slane %v1235_v50, %v3978_v5  ;;  %v1789_v43 = vperm.slane %v1783_v52, %v3978_v5  ;;  %v1795_v6 = vsel %vm390_vm2, %v6650_v46, %v4990_v20  ;;  %v1797_v4 = vsel %vm390_vm2, %v4977_v18, %v6651_v0 }
 0x16e   : > { %v1785_v10 = vsel %vm390_vm2, %v4968_v38, %v6649_v19  ;;  %v1801_v2 = vperm.slane %v1795_v6, %v3978_v5  ;;  %v1805_v38 = vperm.slane %v1797_v4, %v3978_v5  ;;  %v6652_v52 = vrot.slane %v4993_v55, 4 }
 0x16f   : > { %v1793_v44 = vperm.slane %v1785_v10, %v3978_v5  ;;  %v6653_v46 = vrot.slane %v4996_v11, 4  ;;  %v1832_v50 = vrot.slane %v1789_v43, 4  ;;  %v1834_v0 = vrot.slane %v5022_v54, 4 }
 0x170   : > { %v1807_v19 = vsel %vm390_vm2, %v6652_v52, %v4981_v35  ;;  %v1840_v56 = vrot.slane %v1801_v2, 4  ;;  %v1842_v4 = vrot.slane %v5034_v51, 4  ;;  %v1844_v27 = vrot.slane %v1805_v38, 4 }
 0x171   : > { %v1819_v10 = vsel %vm390_vm2, %v6653_v46, %v4985_v30  ;;  %v1813_v20 = vperm.slane %v1807_v19, %v3978_v5  ;;  %v1836_v6 = vrot.slane %v1793_v44, 4  ;;  %v762_v55 = vrot.slane %v384_v47, 4 }
 0x172   : > { %v1825_v18 = vperm.slane %v1819_v10, %v3978_v5  ;;  %v5153_v11 = vsel %vm390_vm2, %v1834_v0, %v1793_v44  ;;  %v5163_v10 = vsel %vm390_vm2, %v1842_v4, %v1805_v38  ;;  %v5167_v40 = vsel %vm390_vm2, %v5034_v51, %v1844_v27 }
 0x173   : > { %v1830_v52 = vrot.slane %v1813_v20, 4  ;;  %v5157_v30 = vsel %vm390_vm2, %v5022_v54, %v1836_v6  ;;  %v5160_v19 = vsel %vm390_vm2, %v1813_v20, %v1832_v50  ;;  %v2406_v44 = vrot.slane %v5153_v11, 4 }
 0x174   : > { %v1838_v46 = vrot.slane %v1825_v18, 4  ;;  %v5170_v35 = vsel %vm390_vm2, %v1825_v18, %v1840_v56  ;;  %v2418_v0 = vrot.slane %v5157_v30, 4  ;;  %v2430_v54 = vrot.slane %v5163_v10, 4 }
 0x175   : > { %v5176_v50 = vsel %vm390_vm2, %v1830_v52, %v1789_v43  ;;  %v2442_v38 = vrot.slane %v5167_v40, 4  ;;  %v763_v51 = vsel %vm390_vm2, %v762_v55, %v372_v7  ;;  %v380_v43 = vpop.permute.xlu0 %379  ;;  %v6668_v17 = vrot.slane %v5099_v63, 4 }
 0x176   : > { %v5179_v20 = vsel %vm390_vm2, %v1838_v46, %v1801_v2  ;;  %v2407_v56 = vsel %vm390_vm2, %v2406_v44, %v5176_v50  ;;  %v2419_v18 = vsel %vm390_vm2, %v2418_v0, %v5160_v19  ;;  %v765_v44 = vsel %vm390_vm2, %v384_v47, %v764_v34 }
 0x177   : > { %v2431_v6 = vsel %vm390_vm2, %v2430_v54, %v5179_v20  ;;  %v5191_v4 = vperm.slane %v2419_v18, %v3942_v26  ;;  %v2443_v7 = vsel %vm390_vm2, %v2442_v38, %v5170_v35  ;;  %v5198_v52 = vperm.slane %v2407_v56, %v3942_v26 }
 0x178   : > { %v5201_v46 = vperm.slane %v2443_v7, %v3942_v26  ;;  %v769_v0 = vperm.slane %v763_v51, %v3942_v26  ;;  %v5206_v54 = vperm.slane %v2431_v6, %v3942_v26  ;;  %v773_v2 = vperm.slane %v765_v44, %v3942_v26 }
 0x179   : > { %v2454_v18 = vrot.slane %v5191_v4, 4  ;;  %v1198_v38 = vrot.slane %v380_v43, 4  ;;  %v6654_v56 = vrot.slane %v5066_v8, 4  ;;  %v5217_v34 = vsel %vm390_vm2, %v380_v43, %v6655_v59 }
 0x17a   : > { %v2478_v55 = vrot.slane %v5201_v46, 4  ;;  %v798_v27 = vrot.slane %v769_v0, 4  ;;  %v810_v6 = vrot.slane %v773_v2, 4  ;;  %v6656_v44 = vrot.slane %v5080_v53, 4 }
 0x17b   : > { %v801_v7 = vsel %vm390_vm2, %v769_v0, %v6654_v56  ;;  %v2455_v47 = vsel %vm390_vm2, %v2454_v18, %v5198_v52 }
 0x17c   : > { %v809_v51 = vperm.slane %v801_v7, %v3978_v5  ;;  %v813_v14 = vsel %vm390_vm2, %v773_v2, %v6656_v44  ;;  %v5226_v13 = vperm.slane %v2455_v47, %v3978_v5  ;;  %v2479_v0 = vsel %vm390_vm2, %v2478_v55, %v5206_v54 }
 0x17d   : > { %v799_v59 = vsel %vm390_vm2, %v798_v27, %v5066_v8  ;;  %v821_v43 = vperm.slane %v813_v14, %v3978_v5  ;;  %v5234_v18 = vperm.slane %v2479_v0, %v3978_v5  ;;  %v811_v7 = vsel %vm390_vm2, %v810_v6, %v5080_v53 }
 0x17e   : > { %6657 = vst [vmem:[#allocation48_spill] sm:$0xff] %v5226_v13  ;;  %v805_v56 = vperm.slane %v799_v59, %v3978_v5  ;;  %v826_v2 = vrot.slane %v809_v51, 4  ;;  %v2504_v47 = vrot.slane %v5226_v13, 4  ;;  %v817_v44 = vperm.slane %v811_v7, %v3978_v5 }
 0x17f   : > { %6658 = vst [vmem:[#allocation49_spill] sm:$0xff] %v5234_v18  ;;  %v6659_v55 = vrot.slane %v5069_v12, 4  ;;  %v834_v8 = vrot.slane %v821_v43, 4  ;;  %v6660_v14 = vrot.slane %v5057_v45, 4  ;;  %v1199_v53 = vsel %vm390_vm2, %v1198_v38, %v4955_v41 }
 0x180   : > { %v822_v27 = vrot.slane %v805_v56, 4  ;;  %v827_v59 = vsel %vm390_vm2, %v826_v2, %v5069_v12  ;;  %v2505_v6 = vsel %vm390_vm2, %v5234_v18, %v2504_v47  ;;  %v830_v7 = vrot.slane %v817_v44, 4 }
 0x181   : > { %v829_v49 = vsel %vm390_vm2, %v809_v51, %v6659_v55  ;;  %v825_v0 = vsel %vm390_vm2, %v805_v56, %v6660_v14  ;;  %v6661_v13 = vrot.slane %v5060_v23, 4  ;;  %v835_v55 = vsel %vm390_vm2, %v834_v8, %v5073_v39  ;;  %3086 = vrot.lane.b32.xlu2 %v2505_v6, %s3732_s22 }
 0x182   : > { %v823_v56 = vsel %vm390_vm2, %v822_v27, %v5057_v45  ;;  %v6662_v12 = vrot.slane %v5073_v39, 4  ;;  %v1958_v38 = vrot.slane %v827_v59, 4  ;;  %v1970_v2 = vrot.slane %v829_v49, 4 }
 0x183   : > { %v833_v51 = vsel %vm390_vm2, %v817_v44, %v6661_v13  ;;  %v831_v47 = vsel %vm390_vm2, %v830_v7, %v5060_v23  ;;  %v1960_v14 = vrot.slane %v823_v56, 4  ;;  %v1972_v48 = vrot.slane %v825_v0, 4 }
 0x184   : > { %v837_v41 = vsel %vm390_vm2, %v821_v43, %v6662_v12  ;;  %v1982_v13 = vrot.slane %v835_v55, 4  ;;  %v1959_v44 = vsel %vm390_vm2, %v1958_v38, %v823_v56  ;;  %v1971_v8 = vsel %vm390_vm2, %v1970_v2, %v825_v0 }
 0x185   : > { %v1984_v6 = vrot.slane %v831_v47, 4  ;;  %v1994_v29 = vrot.slane %v837_v41, 4  ;;  %v1961_v45 = vsel %vm390_vm2, %v827_v59, %v1960_v14  ;;  %v5270_v39 = vperm.slane %v1959_v44, %v3942_v26 }
 0x186   : > { %v1973_v43 = vsel %vm390_vm2, %v829_v49, %v1972_v48  ;;  %v5274_v27 = vperm.slane %v1971_v8, %v3942_v26  ;;  %v5277_v23 = vperm.slane %v1961_v45, %v3942_v26  ;;  %v1983_v0 = vsel %vm390_vm2, %v1982_v13, %v831_v47 }
 0x187   : > { %v5280_v7 = vperm.slane %v1973_v43, %v3942_v26  ;;  %v1985_v56 = vsel %vm390_vm2, %v835_v55, %v1984_v6  ;;  %v5285_v59 = vperm.slane %v1983_v0, %v3942_v26  ;;  %v1995_v48 = vsel %vm390_vm2, %v1994_v29, %v833_v51 }
 0x188   : > { %v5288_v12 = vperm.slane %v1985_v56, %v3942_v26  ;;  %v1996_v49 = vrot.slane %v833_v51, 4  ;;  %v5293_v2 = vperm.slane %v1995_v48, %v3942_v26  ;;  %v2008_v14 = vrot.slane %v5270_v39, 4 }
 0x189   : > { %v2344_v47 = vrot.slane %v4797_v3, 4  ;;  %v2020_v13 = vrot.slane %v5277_v23, 4  ;;  %v2032_v44 = vrot.slane %v5285_v59, 4  ;;  %v1205_v45 = vperm.slane %v1199_v53, %v3942_v26 }
 0x18a   : > { %v1997_v55 = vsel %vm390_vm2, %v837_v41, %v1996_v49  ;;  %v2044_v8 = vrot.slane %v5288_v12, 4  ;;  %v5309_v3 = vsel %vm390_vm2, %v5274_v27, %v2008_v14  ;;  %v1209_v0 = vperm.slane %v5217_v34, %v3942_v26 }
 0x18b   : > { %v5302_v29 = vperm.slane %v1997_v55, %v3942_v26  ;;  %v2033_v43 = vsel %vm390_vm2, %v5293_v2, %v2032_v44  ;;  %v5318_v56 = vsel %vm390_vm2, %v5280_v7, %v2020_v13  ;;  %v6663_v49 = vrot.slane %v5102_v42, 4 }
 0x18c   : > { %v5321_v48 = vperm.slane %v2033_v43, %v3978_v5  ;;  %v1248_v55 = vrot.slane %v1205_v45, 4  ;;  %v6664_v38 = vrot.slane %v5105_v61, 4  ;;  %v2345_v13 = vsel %vm390_vm2, %v4787_v24, %v2344_v47 }
 0x18d   : > { %v2045_v53 = vsel %vm390_vm2, %v5302_v29, %v2044_v8  ;;  %v1247_v14 = vsel %vm390_vm2, %v6663_v49, %v1205_v45  ;;  %v1260_v8 = vrot.slane %v1209_v0, 4  ;;  %v6665_v51 = vrot.slane %v5114_v16, 4 }
 0x18e   : > { %v1253_v44 = vperm.slane %v1247_v14, %v3978_v5  ;;  %v1259_v34 = vsel %vm390_vm2, %v6664_v38, %v1209_v0  ;;  %v5336_v41 = vperm.slane %v2045_v53, %v3978_v5  ;;  %v1249_v45 = vsel %vm390_vm2, %v5102_v42, %v1248_v55 }
 0x18f   : > { %v1265_v6 = vperm.slane %v1259_v34, %v3978_v5  ;;  %v1257_v24 = vperm.slane %v1249_v45, %v3978_v5  ;;  %v1261_v47 = vsel %vm390_vm2, %v5105_v61, %v1260_v8  ;;  %v6666_v0 = vrot.slane %v5117_v37, 4 }
 0x190   : > { %v1270_v14 = vrot.slane %v1253_v44, 4  ;;  %v1273_v38 = vsel %vm390_vm2, %v1253_v44, %v6665_v51  ;;  %v1269_v49 = vperm.slane %v1261_v47, %v3978_v5  ;;  %v6667_v51 = vrot.slane %v5093_v62, 4 }
 0x191   : > { %v1278_v53 = vrot.slane %v1265_v6, 4  ;;  %v1281_v34 = vsel %vm390_vm2, %v1265_v6, %v6666_v0  ;;  %v2084_v55 = vrot.slane %v1273_v38, 4  ;;  %v1274_v18 = vrot.slane %v1257_v24, 4 }
 0x192   : > { %v1271_v42 = vsel %vm390_vm2, %v1270_v14, %v5114_v16  ;;  %v2108_v43 = vrot.slane %v1281_v34, 4  ;;  %v1277_v44 = vsel %vm390_vm2, %v1257_v24, %v6667_v51  ;;  %v1282_v45 = vrot.slane %v1269_v49, 4 }
 0x193   : > { %v1279_v61 = vsel %vm390_vm2, %v1278_v53, %v5117_v37  ;;  %v2072_v8 = vrot.slane %v1271_v42, 4  ;;  %v1285_v6 = vsel %vm390_vm2, %v1269_v49, %v6668_v17  ;;  %v2082_v47 = vrot.slane %v1277_v44, 4 }
 0x194   : > { %v2085_v0 = vsel %vm390_vm2, %v1277_v44, %v2084_v55  ;;  %v1275_v16 = vsel %vm390_vm2, %v1274_v18, %v5093_v62  ;;  %v2096_v31 = vrot.slane %v1279_v61, 4  ;;  %v2106_v24 = vrot.slane %v1285_v6, 4 }
 0x195   : > { %v5366_v14 = vperm.slane %v2085_v0, %v3942_v26  ;;  %v1283_v37 = vsel %vm390_vm2, %v1282_v45, %v5099_v63  ;;  %v2070_v53 = vrot.slane %v1275_v16, 4  ;;  %v2073_v51 = vsel %vm390_vm2, %v1275_v16, %v2072_v8 }
 0x196   : > { %v2083_v57 = vsel %vm390_vm2, %v2082_v47, %v1273_v38  ;;  %v5373_v17 = vperm.slane %v2073_v51, %v3942_v26  ;;  %v2094_v62 = vrot.slane %v1283_v37, 4  ;;  %v2097_v18 = vsel %vm390_vm2, %v1283_v37, %v2096_v31 }
 0x197   : > { %v5376_v49 = vperm.slane %v2083_v57, %v3942_v26  ;;  %v2071_v55 = vsel %vm390_vm2, %v2070_v53, %v1271_v42  ;;  %v5381_v44 = vperm.slane %v2097_v18, %v3942_v26  ;;  %v2107_v63 = vsel %vm390_vm2, %v2106_v24, %v1281_v34 }
 0x198   : > { %v2109_v8 = vsel %vm390_vm2, %v1285_v6, %v2108_v43  ;;  %v5386_v38 = vperm.slane %v2071_v55, %v3942_v26  ;;  %v2095_v45 = vsel %vm390_vm2, %v2094_v62, %v1279_v61  ;;  %v2113_v57 = vperm.slane %v2107_v63, %v3942_v26 }
 0x199   : > { %v5391_v47 = vperm.slane %v2109_v8, %v3942_v26  ;;  %v2066_v31 = vrot.slane %v5336_v41, 4  ;;  %v2101_v42 = vperm.slane %v2095_v45, %v3942_v26  ;;  %v2118_v0 = vrot.slane %v5376_v49, 4 }
 0x19a   : > { %v5397_v34 = vperm.slane %v2345_v13, %v3978_v5  ;;  %v2120_v43 = vrot.slane %v5386_v38, 4  ;;  %v2130_v6 = vrot.slane %v5366_v14, 4  ;;  %v2142_v16 = vrot.slane %v2113_v57, 4 }
 0x19b   : > { %v2156_v61 = vrot.slane %v5381_v44, 4  ;;  %v2132_v24 = vrot.slane %v5373_v17, 4  ;;  %v2144_v37 = vrot.slane %v2101_v42, 4  ;;  %v2368_v53 = vrot.slane %v4805_v9, 4 }
 0x19c   : > { %v2284_v51 = vrot.slane %v5016_v1, 4  ;;  %v5407_v62 = vsel %vm390_vm2, %v5376_v49, %v2120_v43  ;;  %v5410_v13 = vsel %vm390_vm2, %v2142_v16, %v2101_v42  ;;  %v2154_v18 = vrot.slane %v5391_v47, 4 }
 0x19d   : > { %v2157_v55 = vsel %vm390_vm2, %v5391_v47, %v2156_v61  ;;  %v2145_v63 = vsel %vm390_vm2, %v2113_v57, %v2144_v37  ;;  %v2369_v8 = vsel %vm390_vm2, %v4800_v36, %v2368_v53  ;;  %v6669_v42 = vrot.slane %v4439_v58, 4  ;;  %v3083_v53 = vpop.permute.xlu0 %3082 }
 0x19e   : > { %v2285_v9 = vsel %vm390_vm2, %v5029_v15, %v2284_v51  ;;  %v5421_v1 = vperm.slane %v2157_v55, %v3978_v5  ;;  %v5424_v45 = vperm.slane %v2369_v8, %v3978_v5  ;;  %v6670_v57 = vrot.slane %v5274_v27, 4 }
 0x19f   : > { %v2279_v43 = vsel %vm390_vm2, %v6669_v42, %v4436_v22  ;;  %v2017_v15 = vperm.slane %v5309_v3, %v3978_v5  ;;  %v6671_v61 = vrot.slane %v5280_v7, 4  ;;  %v2029_v58 = vperm.slane %v5318_v56, %v3978_v5 }
 0x1a0   : > { %v2007_v36 = vsel %vm390_vm2, %v6670_v57, %v5270_v39  ;;  %v5444_v22 = vperm.slane %v2145_v63, %v3978_v5  ;;  %v2394_v27 = vrot.slane %v5424_v45, 4  ;;  %v6672_v51 = vrot.slane %v5293_v2, 4 }
 0x1a1   : > { %v2013_v16 = vperm.slane %v2007_v36, %v3978_v5  ;;  %v2019_v37 = vsel %vm390_vm2, %v6671_v61, %v5277_v23  ;;  %v6673_v23 = vrot.slane %v5302_v29, 4  ;;  %v6674_v63 = vrot.slane %v5321_v48, 4 }
 0x1a2   : > { %v2025_v39 = vperm.slane %v2019_v37, %v3978_v5  ;;  %v2031_v3 = vsel %vm390_vm2, %v6672_v51, %v5285_v59  ;;  %v2395_v42 = vsel %vm390_vm2, %v2394_v27, %v5397_v34  ;;  %v2060_v57 = vrot.slane %v2017_v15, 4 }
 0x1a3   : > { %v2037_v7 = vperm.slane %v2031_v3, %v3978_v5  ;;  %v2043_v56 = vsel %vm390_vm2, %v6673_v23, %v5288_v12  ;;  %v2056_v55 = vrot.slane %v2013_v16, 4  ;;  %v5460_v8 = vsel %vm390_vm2, %v6674_v63, %v2017_v15  ;;  %3100 = vrot.lane.b32.xlu2 %v2395_v42, %s3731_s21 }
 0x1a4   : > { %v2049_v2 = vperm.slane %v2043_v56, %v3978_v5  ;;  %v2064_v59 = vrot.slane %v2025_v39, 4  ;;  %v5467_v36 = vsel %vm3318_vm3, %v2279_v43, %v3083_v53  ;;  %v5470_v12 = vsel %vm390_vm2, %v2066_v31, %v2029_v58 }
 0x1a5   : > { %v2054_v29 = vrot.slane %v2037_v7, 4  ;;  %v2068_v61 = vrot.slane %v2029_v58, 4  ;;  %v5474_v37 = vsel %vm390_vm2, %v5321_v48, %v2060_v57  ;;  %v2518_v15 = vrot.slane %v5460_v8, 4 }
 0x1a6   : > { %v2062_v51 = vrot.slane %v2049_v2, 4  ;;  %v5477_v27 = vsel %vm390_vm2, %v2049_v2, %v2064_v59  ;;  %v2530_v31 = vrot.slane %v5474_v37, 4  ;;  %v2542_v58 = vrot.slane %v5470_v12, 4 }
 0x1a7   : > { %v5481_v3 = vsel %vm390_vm2, %v2054_v29, %v2013_v16  ;;  %v5485_v43 = vsel %vm390_vm2, %v5336_v41, %v2068_v61  ;;  %v5490_v48 = vsel %vm390_vm2, %v2037_v7, %v2056_v55  ;;  %v2556_v42 = vrot.slane %v5477_v27, 4 }
 0x1a8   : > { %v5493_v53 = vsel %vm390_vm2, %v2062_v51, %v2025_v39  ;;  %v2519_v23 = vsel %vm390_vm2, %v2518_v15, %v5481_v3  ;;  %v2554_v16 = vrot.slane %v5485_v43, 4  ;;  %v2531_v41 = vsel %vm390_vm2, %v2530_v31, %v5490_v48 }
 0x1a9   : > { %v2525_v56 = vperm.slane %v2519_v23, %v3942_v26  ;;  %v2543_v63 = vsel %vm390_vm2, %v2542_v58, %v5493_v53  ;;  %v2537_v7 = vperm.slane %v2531_v41, %v3942_v26  ;;  %v2408_v2 = vrot.slane %v5176_v50, 4 }
 0x1aa   : > { %v2549_v39 = vperm.slane %v2543_v63, %v3942_v26  ;;  %v2555_v55 = vsel %vm390_vm2, %v2554_v16, %v5477_v27  ;;  %v2544_v57 = vrot.slane %v5493_v53, 4  ;;  %v2420_v61 = vrot.slane %v5160_v19, 4  ;;  %v6696_v53 = vld [vmem:[#allocation35_spill] sm:$0xff] }
 0x1ab   : > { %v2561_v59 = vperm.slane %v2555_v55, %v3942_v26  ;;  %v2568_v29 = vrot.slane %v2525_v56, 4  ;;  %v2566_v15 = vrot.slane %v2537_v7, 4  ;;  %v2409_v31 = vsel %vm390_vm2, %v5153_v11, %v2408_v2  ;;  %3114 = vrot.lane.b32.xlu2 %v2285_v9, %s3730_s18 }
 0x1ac   : > { %v2592_v51 = vrot.slane %v2549_v39, 4  ;;  %v6675_v58 = vrot.slane %v5179_v20, 4  ;;  %v5521_v41 = vperm.slane %v2409_v31, %v3942_v26  ;;  %v2421_v19 = vsel %vm390_vm2, %v5157_v30, %v2420_v61 }
 0x1ad   : > { %v2569_v50 = vsel %vm390_vm2, %v2537_v7, %v2568_v29  ;;  %v2590_v16 = vrot.slane %v2561_v59, 4  ;;  %v2567_v20 = vsel %vm390_vm2, %v2566_v15, %v2525_v56  ;;  %v5529_v55 = vperm.slane %v2421_v19, %v3942_v26 }
 0x1ae   : > { %v2433_v23 = vsel %vm390_vm2, %v5163_v10, %v6675_v58  ;;  %v2577_v63 = vperm.slane %v2569_v50, %v3978_v5  ;;  %v2593_v11 = vsel %vm390_vm2, %v2561_v59, %v2592_v51  ;;  %v5533_v9 = vperm.slane %v2567_v20, %v3978_v5 }
 0x1af   : > { %v2601_v10 = vperm.slane %v2593_v11, %v3978_v5  ;;  %v2591_v7 = vsel %vm390_vm2, %v2590_v16, %v2549_v39  ;;  %v6677_v2 = vrot.slane %v5170_v35, 4  ;;  %v2466_v61 = vrot.slane %v5529_v55, 4 }
 0x1b0   : > { %6676 = vst [vmem:[#allocation50_spill] sm:$0xff] %v5533_v9  ;;  %v2620_v29 = vrot.slane %v2577_v63, 4  ;;  %v5541_v59 = vperm.slane %v2591_v7, %v3978_v5  ;;  %v2616_v15 = vrot.slane %v5533_v9, 4  ;;  %v2456_v31 = vrot.slane %v5198_v52, 4 }
 0x1b1   : > { %v2445_v30 = vsel %vm390_vm2, %v5167_v40, %v6677_v2  ;;  %v2618_v51 = vrot.slane %v2601_v10, 4  ;;  %v2480_v39 = vrot.slane %v5206_v54, 4  ;;  %v5552_v40 = vperm.slane %v2433_v23, %v3942_v26 }
 0x1b2   : > { %6678 = vst [vmem:[#allocation51_spill] sm:$0xff] %v5541_v59  ;;  %v5544_v56 = vperm.slane %v2445_v30, %v3942_v26  ;;  %v2621_v35 = vsel %vm390_vm2, %v2601_v10, %v2620_v29  ;;  %v2467_v58 = vsel %vm390_vm2, %v2466_v61, %v5521_v41  ;;  %v2617_v19 = vsel %vm390_vm2, %v5541_v59, %v2616_v15 }
 0x1b3   : > { %v2619_v16 = vsel %vm390_vm2, %v2618_v51, %v2577_v63  ;;  %v5561_v11 = vperm.slane %v2467_v58, %v3978_v5  ;;  %v2457_v52 = vsel %vm390_vm2, %v5191_v4, %v2456_v31  ;;  %3088 = vrot.lane.b32.xlu0 %v2617_v19, %s3732_s22  ;;  %v2481_v63 = vsel %vm390_vm2, %v5201_v46, %v2480_v39  ;;  %v6682_v31 = vld [vmem:[#allocation34_spill] sm:$0xff]  ;;  %v6684_v39 = vld [vmem:[#allocation33_spill] sm:$0xff] }
 0x1b4   : > { %v2490_v50 = vrot.slane %v5544_v56, 4  ;;  %3104 = vrot.lane.b32.xlu1 %v2619_v16, %s3731_s21  ;;  %v2465_v23 = vperm.slane %v2457_v52, %v3978_v5  ;;  %v2396_v20 = vrot.slane %v5397_v34, 4  ;;  %3120 = vrot.lane.b32.xlu2 %v2621_v35, %s3730_s18  ;;  %v2489_v4 = vperm.slane %v2481_v63, %v3978_v5  ;;  %v6685_v52 = vld [vmem:[#allocation16_spill] sm:$0xff]  ;;  %v6687_v63 = vld [vmem:[#allocation15_spill] sm:$0xff] }
 0x1b5   : > { %v6679_v7 = vrot.slane %v4759_v25, 4  ;;  %v6680_v30 = vrot.slane %v4749_v33, 4  ;;  %v6681_v51 = vrot.slane %v4771_v32, 4  ;;  %v2129_v49 = vperm.slane %v5407_v62, %v3978_v5 }
 0x1b6   : > { %v2491_v54 = vsel %vm390_vm2, %v2490_v50, %v5552_v40  ;;  %v2508_v46 = vrot.slane %v2465_v23, 4 }
 0x1b7   : > { %v5575_v10 = vperm.slane %v2491_v54, %v3978_v5  ;;  %v2297_v2 = vsel %vm390_vm2, %v4752_v21, %v6679_v7  ;;  %v2309_v29 = vsel %vm390_vm2, %v4756_v28, %v6680_v30  ;;  %v2321_v25 = vsel %vm390_vm2, %v4762_v60, %v6681_v51  ;;  %v6691_v51 = vld [vmem:[#allocation18_spill] sm:$0xff] }
 0x1b8   : > { %v5587_v34 = vperm.slane %v2297_v2, %v3942_v26  ;;  %v5590_v61 = vperm.slane %v2309_v29, %v3942_v26  ;;  %v2506_v21 = vrot.slane %v2489_v4, 4  ;;  %v5598_v33 = vperm.slane %v2321_v25, %v3942_v26  ;;  %v6688_v2 = vld [vmem:[#allocation19_spill] sm:$0xff] }
 0x1b9   : > { %v2510_v15 = vrot.slane %v5575_v10, 4  ;;  %v6683_v28 = vrot.slane %v6682_v31, 4  ;;  %v2509_v58 = vsel %vm390_vm2, %v2489_v4, %v2508_v46  ;;  %v2397_v60 = vsel %vm390_vm2, %v5424_v45, %v2396_v20  ;;  %v6689_v45 = vld [vmem:[#allocation20_spill] sm:$0xff] }
 0x1ba   : > { %v2354_v32 = vrot.slane %v5590_v61, 4  ;;  %v2507_v19 = vsel %vm390_vm2, %v2506_v21, %v2465_v23  ;;  %v6686_v54 = vrot.slane %v6685_v52, 4  ;;  %v2196_v4 = vrot.slane %v6688_v2, 4 }
 0x1bb   : > { %v2333_v35 = vsel %vm390_vm2, %v6684_v39, %v6683_v28  ;;  %v2511_v16 = vsel %vm390_vm2, %v2510_v15, %v5561_v11  ;;  %v6690_v20 = vrot.slane %v6689_v45, 4  ;;  %v6692_v15 = vld [vmem:[#allocation17_spill] sm:$0xff]  ;;  %v6693_v28 = vld [vmem:[#allocation22_spill] sm:$0xff]  ;;  %3102 = vrot.lane.b32.xlu0 %v2507_v19, %s3731_s21  ;;  %v2520_v45 = vrot.slane %v5481_v3, 4 }
 0x1bc   : > { %v5606_v50 = vperm.slane %v2333_v35, %v3942_v26  ;;  %v2185_v7 = vsel %vm390_vm2, %v6687_v63, %v6686_v54  ;;  %v2355_v30 = vsel %vm390_vm2, %v2354_v32, %v5587_v34  ;;  %v2197_v21 = vsel %vm390_vm2, %v6692_v15, %v2196_v4  ;;  %v6695_v35 = vld [vmem:[#allocation21_spill] sm:$0xff]  ;;  %3118 = vrot.lane.b32.xlu1 %v2509_v58, %s3730_s18 }
 0x1bd   : > { %v2193_v46 = vperm.slane %v2185_v7, %v3942_v26  ;;  %v2209_v25 = vsel %vm390_vm2, %v6691_v51, %v6690_v20  ;;  %v2361_v23 = vperm.slane %v2355_v30, %v3978_v5  ;;  %v6694_v39 = vrot.slane %v6693_v28, 4  ;;  %3134 = vrot.lane.b32.xlu2 %v2511_v16, %s3729_s17 }
 0x1be   : > { %v2378_v29 = vrot.slane %v5606_v50, 4  ;;  %v2217_v31 = vperm.slane %v2209_v25, %v3942_v26  ;;  %v2205_v54 = vperm.slane %v2197_v21, %v3942_v26  ;;  %v2532_v51 = vrot.slane %v5490_v48, 4 }
 0x1bf   : > { %v2221_v32 = vsel %vm390_vm2, %v6695_v35, %v6694_v39  ;;  %v2244_v7 = vrot.slane %v2193_v46, 4  ;;  %v2400_v4 = vrot.slane %v2361_v23, 4  ;;  %v2521_v39 = vsel %vm390_vm2, %v5460_v8, %v2520_v45 }
 0x1c0   : > { %v2379_v52 = vsel %vm390_vm2, %v2378_v29, %v5598_v33  ;;  %v2229_v63 = vperm.slane %v2221_v32, %v3942_v26  ;;  %v2268_v30 = vrot.slane %v2217_v31, 4  ;;  %v2242_v20 = vrot.slane %v2205_v54, 4 }
 0x1c1   : > { %v2385_v2 = vperm.slane %v2379_v52, %v3978_v5  ;;  %v2245_v58 = vsel %vm390_vm2, %v2205_v54, %v2244_v7  ;;  %v2529_v52 = vperm.slane %v2521_v39, %v3942_v26  ;;  %v2557_v8 = vsel %vm390_vm2, %v5485_v43, %v2556_v42 }
 0x1c2   : > { %v2266_v19 = vrot.slane %v2229_v63, 4  ;;  %v5648_v15 = vperm.slane %v2245_v58, %v3978_v5  ;;  %v2269_v16 = vsel %vm390_vm2, %v2229_v63, %v2268_v30  ;;  %v2243_v28 = vsel %vm390_vm2, %v2242_v20, %v2193_v46 }
 0x1c3   : > { %v2401_v29 = vsel %vm390_vm2, %v2385_v2, %v2400_v4  ;;  %v2398_v25 = vrot.slane %v2385_v2, 4  ;;  %v5652_v21 = vperm.slane %v2269_v16, %v3978_v5  ;;  %v2249_v35 = vperm.slane %v2243_v28, %v3978_v5  ;;  %v3085_v4 = vpop.permute.xlu1 %3084  ;;  %3116 = vrot.lane.b32.xlu0 %v2397_v60, %s3730_s18 }
 0x1c4   : > { %v2267_v3 = vsel %vm390_vm2, %v2266_v19, %v2217_v31  ;;  %v2533_v63 = vsel %vm390_vm2, %v5474_v37, %v2532_v51  ;;  %v2545_v46 = vsel %vm390_vm2, %v5470_v12, %v2544_v57  ;;  %v2565_v12 = vperm.slane %v2557_v8, %v3942_v26  ;;  %v6697_v57 = vld [vmem:[#allocation36_spill] sm:$0xff] }
 0x1c5   : > { %v2399_v48 = vsel %vm390_vm2, %v2398_v25, %v2361_v23  ;;  %v2273_v32 = vperm.slane %v2267_v3, %v3978_v5  ;;  %v2290_v54 = vrot.slane %v5652_v21, 4  ;;  %v2288_v23 = vrot.slane %v2249_v35, 4  ;;  %3148 = vrot.lane.b32.xlu2 %v2401_v29, %s3728_s14 }
 0x1c6   : > { %v2541_v7 = vperm.slane %v2533_v63, %v3942_v26  ;;  %v2553_v2 = vperm.slane %v2545_v46, %v3942_v26  ;;  %3132 = vrot.lane.b32.xlu1 %v2399_v48, %s3729_s17  ;;  %v2580_v27 = vrot.slane %v2529_v52, 4  ;;  %v6698_v43 = vrot.slane %v6697_v57, 4 }
 0x1c7   : > { %v2286_v31 = vrot.slane %v2273_v32, 4  ;;  %v2291_v37 = vsel %vm390_vm2, %v2290_v54, %v5648_v15  ;;  %v2289_v30 = vsel %vm390_vm2, %v2273_v32, %v2288_v23  ;;  %v2602_v19 = vrot.slane %v2565_v12, 4 }
 0x1c8   : > { %v2391_v42 = vsel %vm390_vm2, %v6698_v43, %v6696_v53  ;;  %v2604_v58 = vrot.slane %v2553_v2, 4  ;;  %v2578_v20 = vrot.slane %v2541_v7, 4  ;;  %v2468_v25 = vrot.slane %v5521_v41, 4 }
 0x1c9   : > { %v2287_v45 = vsel %vm390_vm2, %v2286_v31, %v2249_v35  ;;  %v5689_v51 = vsel %vm3318_vm3, %v2391_v42, %v3085_v4  ;;  %v2581_v16 = vsel %vm390_vm2, %v2541_v7, %v2580_v27  ;;  %v2492_v3 = vrot.slane %v5552_v40, 4  ;;  %v6700_v4 = vld [vmem:[#allocation26_spill] sm:$0xff] }
 0x1ca   : > { %v2605_v28 = vsel %vm390_vm2, %v2565_v12, %v2604_v58  ;;  %v2579_v29 = vsel %vm390_vm2, %v2578_v20, %v2529_v52  ;;  %v2603_v35 = vsel %vm390_vm2, %v2602_v19, %v2553_v2  ;;  %v2469_v32 = vsel %vm390_vm2, %v5529_v55, %v2468_v25  ;;  %v6699_v2 = vld [vmem:[#allocation29_spill] sm:$0xff]  ;;  %v6704_v19 = vld [vmem:[#allocation23_spill] sm:$0xff] }
 0x1cb   : > { %v5697_v39 = vperm.slane %v2605_v28, %v3978_v5  ;;  %v2585_v48 = vperm.slane %v2579_v29, %v3978_v5  ;;  %v2609_v41 = vperm.slane %v2603_v35, %v3978_v5  ;;  %v2477_v54 = vperm.slane %v2469_v32, %v3978_v5  ;;  %3130 = vrot.lane.b32.xlu0 %v2287_v45, %s3729_s17  ;;  %v6703_v20 = vld [vmem:[#allocation25_spill] sm:$0xff]  ;;  %v6707_v29 = vld [vmem:[#allocation27_spill] sm:$0xff] }
 0x1cc   : > { %v2493_v63 = vsel %vm390_vm2, %v5544_v56, %v2492_v3  ;;  %v2512_v52 = vrot.slane %v5561_v11, 4  ;;  %v5709_v40 = vperm.slane %v2581_v16, %v3978_v5  ;;  %v6701_v12 = vrot.slane %v6700_v4, 4  ;;  %v6708_v3 = vld [vmem:[#allocation28_spill] sm:$0xff]  ;;  %v6732_v11 = vld [vmem:[#allocation9_spill] sm:$0xff] }
 0x1cd   : > { %v2626_v46 = vrot.slane %v5697_v39, 4  ;;  %v2624_v8 = vrot.slane %v2585_v48, 4  ;;  %v2501_v23 = vperm.slane %v2493_v63, %v3978_v5  ;;  %v2622_v31 = vrot.slane %v2609_v41, 4  ;;  %3162 = vrot.lane.b32.xlu2 %v2291_v37, %s3727_s6 }
 0x1ce   : > { %v2516_v7 = vrot.slane %v2477_v54, 4  ;;  %v5715_v55 = vsel %vm390_vm2, %v5575_v10, %v2512_v52  ;;  %v1671_v56 = vsel %vm390_vm2, %v6701_v12, %v6699_v2  ;;  %3146 = vrot.lane.b32.xlu1 %v2289_v30, %s3728_s14  ;;  %v6702_v57 = vrot.slane %v6699_v2, 4  ;;  %v6710_v52 = vld [vmem:[#allocation24_spill] sm:$0xff]  ;;  %v6713_v2 = vld [vmem:[#allocation31_spill] sm:$0xff] }
 0x1cf   : > { %v2627_v27 = vsel %vm390_vm2, %v2626_v46, %v5709_v40  ;;  %v2625_v53 = vsel %vm390_vm2, %v2609_v41, %v2624_v8  ;;  %v2623_v43 = vsel %vm390_vm2, %v2622_v31, %v2585_v48  ;;  %v2514_v42 = vrot.slane %v2501_v23, 4  ;;  %v6711_v46 = vld [vmem:[#allocation30_spill] sm:$0xff] }
 0x1d0   : > { %v1673_v10 = vsel %vm390_vm2, %v6700_v4, %v6702_v57  ;;  %v1677_v58 = vperm.slane %v1671_v56, %v3978_v5  ;;  %v5736_v45 = vsel %vm390_vm2, %v2501_v23, %v2516_v7  ;;  %v6705_v25 = vrot.slane %v6704_v19, 4 }
 0x1d1   : > { %v1681_v30 = vperm.slane %v1673_v10, %v3978_v5  ;;  %v6706_v28 = vrot.slane %v6703_v20, 4  ;;  %v6709_v48 = vrot.slane %v6708_v3, 4  ;;  %v6712_v8 = vrot.slane %v6711_v46, 4  ;;  %v6714_v10 = vld [vmem:[#allocation32_spill] sm:$0xff] }
 0x1d2   : > { %v1683_v16 = vsel %vm390_vm2, %v6705_v25, %v6703_v20  ;;  %v1720_v7 = vrot.slane %v1677_v58, 4  ;;  %v1722_v4 = vrot.slane %v6713_v2, 4  ;;  %v1730_v20 = vrot.slane %v6714_v10, 4 }
 0x1d3   : > { %v1685_v37 = vsel %vm390_vm2, %v6704_v19, %v6706_v28  ;;  %v1695_v35 = vsel %vm390_vm2, %v6709_v48, %v6707_v29  ;;  %v1689_v32 = vperm.slane %v1683_v16, %v3978_v5  ;;  %v1707_v23 = vsel %vm390_vm2, %v6712_v8, %v6710_v52  ;;  %3136 = vrot.lane.b32.xlu0 %v2623_v43, %s3729_s17 }
 0x1d4   : > { %v1693_v41 = vperm.slane %v1685_v37, %v3978_v5  ;;  %v1701_v63 = vperm.slane %v1695_v35, %v3978_v5  ;;  %v1713_v31 = vperm.slane %v1707_v23, %v3978_v5  ;;  %v1724_v12 = vrot.slane %v1681_v30, 4 }
 0x1d5   : > { %v1728_v57 = vrot.slane %v1689_v32, 4  ;;  %v5764_v16 = vsel %vm390_vm2, %v1722_v4, %v1681_v30  ;;  %v2515_v30 = vsel %vm390_vm2, %v2514_v42, %v2477_v54  ;;  %3168 = vrot.lane.b32.xlu2 %v2627_v27, %s3727_s6  ;;  %v6733_v42 = vld [vmem:[#allocation12_spill] sm:$0xff]  ;;  %v2172_v47 = vrot.slane %v2129_v49, 4 }
 0x1d6   : > { %v1718_v56 = vrot.slane %v1701_v63, 4  ;;  %v1732_v19 = vrot.slane %v1693_v41, 4  ;;  %v5761_v25 = vsel %vm390_vm2, %v1701_v63, %v1720_v7  ;;  %v5768_v28 = vsel %vm390_vm2, %v6713_v2, %v1724_v12  ;;  %3152 = vrot.lane.b32.xlu1 %v2625_v53, %s3728_s14  ;;  %v6718_v7 = vld [vmem:[#allocation49_spill] sm:$0xff] }
 0x1d7   : > { %6715 = vst [vmem:[#allocation34_spill] sm:$0xff] %v5768_v28  ;;  %v1726_v37 = vrot.slane %v1713_v31, 4  ;;  %v5774_v3 = vsel %vm390_vm2, %v1713_v31, %v1728_v57  ;;  %v5777_v48 = vsel %vm390_vm2, %v1730_v20, %v1693_v41  ;;  %v2754_v52 = vrot.slane %v5768_v28, 4 }
 0x1d8   : > { %v5771_v29 = vsel %vm390_vm2, %v1718_v56, %v1677_v58  ;;  %v5781_v35 = vsel %vm390_vm2, %v6714_v10, %v1732_v19  ;;  %v2742_v58 = vrot.slane %v5764_v16, 4  ;;  %v2766_v46 = vrot.slane %v5777_v48, 4 }
 0x1d9   : > { %6716 = vst [vmem:[#allocation33_spill] sm:$0xff] %v5781_v35  ;;  %v5787_v63 = vsel %vm390_vm2, %v1726_v37, %v1689_v32  ;;  %v2778_v8 = vrot.slane %v5781_v35, 4  ;;  %v2356_v53 = vrot.slane %v5587_v34, 4  ;;  %v2755_v43 = vsel %vm390_vm2, %v2754_v52, %v5761_v25  ;;  %v6717_v34 = vld [vmem:[#allocation48_spill] sm:$0xff]  ;;  %v6721_v52 = vld [vmem:[#allocation5_spill] sm:$0xff]  ;;  %v6752_v35 = vld [vmem:[#allocation46_spill] sm:$0xff] }
 0x1da   : > { %v2743_v54 = vsel %vm390_vm2, %v2742_v58, %v5771_v29  ;;  %v2380_v32 = vrot.slane %v5598_v33, 4  ;;  %v5806_v23 = vperm.slane %v2755_v43, %v3942_v26  ;;  %v2767_v31 = vsel %vm390_vm2, %v2766_v46, %v5787_v63  ;;  %v6720_v58 = vld [vmem:[#allocation6_spill] sm:$0xff] }
 0x1db   : > { %v5803_v27 = vperm.slane %v2743_v54, %v3942_v26  ;;  %v6719_v2 = vrot.slane %v6718_v7, 4  ;;  %v5815_v12 = vperm.slane %v2767_v31, %v3942_v26  ;;  %v2779_v33 = vsel %vm390_vm2, %v2778_v8, %v5774_v3  ;;  %v6725_v54 = vld [vmem:[#allocation7_spill] sm:$0xff]  ;;  %3150 = vrot.lane.b32.xlu0 %v5715_v55, %s3728_s14 }
 0x1dc   : > { %v2357_v56 = vsel %vm390_vm2, %v5590_v61, %v2356_v53  ;;  %v2381_v57 = vsel %vm390_vm2, %v5606_v50, %v2380_v32  ;;  %v5824_v10 = vperm.slane %v2779_v33, %v3942_v26  ;;  %v2790_v20 = vrot.slane %v5806_v23, 4  ;;  %v6724_v53 = vld [vmem:[#allocation10_spill] sm:$0xff] }
 0x1dd   : > { %v2503_v4 = vsel %vm390_vm2, %v6719_v2, %v6717_v34  ;;  %v2365_v19 = vperm.slane %v2357_v56, %v3978_v5  ;;  %v2389_v37 = vperm.slane %v2381_v57, %v3978_v5  ;;  %v6722_v46 = vrot.slane %v6721_v52, 4  ;;  %3182 = vrot.lane.b32.xlu2 %v5736_v45, %s3726_s5 }
 0x1de   : > { %v6723_v61 = vrot.slane %v6720_v58, 4  ;;  %v6726_v43 = vrot.slane %v6725_v54, 4  ;;  %v6727_v31 = vrot.slane %v6724_v53, 4  ;;  %v2791_v7 = vsel %vm390_vm2, %v2790_v20, %v5803_v27  ;;  %3166 = vrot.lane.b32.xlu1 %v2515_v30, %s3727_s6 }
 0x1df   : > { %v1447_v8 = vsel %vm390_vm2, %v6722_v46, %v6720_v58  ;;  %v2814_v2 = vrot.slane %v5824_v10, 4  ;;  %v2404_v33 = vrot.slane %v2365_v19, 4  ;;  %v2402_v56 = vrot.slane %v2389_v37, 4  ;;  %v6728_v46 = vld [vmem:[#allocation13_spill] sm:$0xff] }
 0x1e0   : > { %v1449_v50 = vsel %vm390_vm2, %v6721_v52, %v6723_v61  ;;  %v1459_v32 = vsel %vm390_vm2, %v6726_v43, %v6724_v53  ;;  %v1461_v34 = vsel %vm390_vm2, %v6725_v54, %v6727_v31  ;;  %v5852_v57 = vperm.slane %v2791_v7, %v3978_v5  ;;  %v6729_v43 = vld [vmem:[#allocation8_spill] sm:$0xff]  ;;  %v6730_v31 = vld [vmem:[#allocation11_spill] sm:$0xff] }
 0x1e1   : > { %v1453_v58 = vperm.slane %v1447_v8, %v3978_v5  ;;  %v1457_v52 = vperm.slane %v1449_v50, %v3978_v5  ;;  %v1498_v61 = vrot.slane %v6728_v46, 4  ;;  %v2815_v20 = vsel %vm390_vm2, %v2814_v2, %v5815_v12  ;;  %v3087_v8 = vpop.permute.xlu2 %3086 }
 0x1e2   : > { %v2405_v30 = vsel %vm390_vm2, %v2389_v37, %v2404_v33  ;;  %v2403_v53 = vsel %vm390_vm2, %v2402_v56, %v2365_v19  ;;  %v1465_v55 = vperm.slane %v1459_v32, %v3978_v5  ;;  %v5865_v54 = vperm.slane %v2815_v20, %v3978_v5 }
 0x1e3   : > { %v1469_v50 = vperm.slane %v1461_v34, %v3978_v5  ;;  %v6731_v7 = vrot.slane %v6730_v31, 4  ;;  %v6734_v2 = vrot.slane %v6733_v42, 4  ;;  %v5877_v19 = vsel %vm3318_vm3, %v2503_v4, %v3087_v8  ;;  %v6736_v4 = vld [vmem:[#allocation14_spill] sm:$0xff]  ;;  %3164 = vrot.lane.b32.xlu0 %v2403_v53, %s3727_s6 }
 0x1e4   : > { %6735 = vst [vmem:[#allocation16_spill] sm:$0xff] %v5877_v19  ;;  %v1496_v56 = vrot.slane %v1453_v58, 4  ;;  %v2838_v34 = vrot.slane %v5865_v54, 4  ;;  %v5883_v20 = vsel %vm390_vm2, %v1498_v61, %v1457_v52  ;;  %v1500_v31 = vrot.slane %v1457_v52, 4 }
 0x1e5   : > { %v1471_v45 = vsel %vm390_vm2, %v6731_v7, %v6729_v43  ;;  %v1483_v37 = vsel %vm390_vm2, %v6734_v2, %v6732_v11  ;;  %v1504_v43 = vrot.slane %v1465_v55, 4  ;;  %v3099_v7 = vpop.permute.xlu1 %3098  ;;  %v1506_v8 = vrot.slane %v6736_v4, 4 }
 0x1e6   : > { %v1477_v32 = vperm.slane %v1471_v45, %v3978_v5  ;;  %v1489_v33 = vperm.slane %v1483_v37, %v3978_v5  ;;  %v2839_v45 = vsel %vm390_vm2, %v2838_v34, %v5852_v57  ;;  %v5893_v2 = vsel %vm390_vm2, %v6728_v46, %v1500_v31  ;;  %3180 = vrot.lane.b32.xlu1 %v2405_v30, %s3726_s5 }
 0x1e7   : > { %v1508_v52 = vrot.slane %v1469_v50, 4  ;;  %v2630_v60 = vrot.slane %v5883_v20, 4  ;;  %v5910_v34 = vsel %vm3323_vm4, %v5467_v36, %v3099_v7  ;;  %3196 = vrot.lane.b32.xlu2 %v2839_v45, %s3725_s4  ;;  %v2292_v30 = vrot.slane %v5648_v15, 4 }
 0x1e8   : > { %v1494_v41 = vrot.slane %v1477_v32, 4  ;;  %v5886_v42 = vsel %vm390_vm2, %v1477_v32, %v1496_v56  ;;  %v1502_v11 = vrot.slane %v1489_v33, 4  ;;  %v5896_v61 = vsel %vm390_vm2, %v1489_v33, %v1504_v43 }
 0x1e9   : > { %v5905_v56 = vsel %vm390_vm2, %v1506_v8, %v1469_v50 }
 0x1ea   : > { %v5899_v37 = vsel %vm390_vm2, %v1494_v41, %v1453_v58  ;;  %v5902_v32 = vsel %vm390_vm2, %v1502_v11, %v1465_v55  ;;  %v5916_v41 = vsel %vm390_vm2, %v6736_v4, %v1508_v52  ;;  %v2642_v58 = vrot.slane %v5893_v2, 4 }
 0x1eb   : > { %v2654_v46 = vrot.slane %v5905_v56, 4  ;;  %v2631_v55 = vsel %vm390_vm2, %v2630_v60, %v5899_v37  ;;  %v2666_v50 = vrot.slane %v5916_v41, 4  ;;  %v2119_v60 = vsel %vm390_vm2, %v2118_v0, %v5386_v38 }
 0x1ec   : > { %v5927_v53 = vperm.slane %v2631_v55, %v3942_v26  ;;  %v2643_v33 = vsel %vm390_vm2, %v2642_v58, %v5886_v42  ;;  %v2293_v11 = vsel %vm390_vm2, %v5652_v21, %v2292_v30  ;;  %v2125_v8 = vperm.slane %v2119_v60, %v3978_v5 }
 0x1ed   : > { %v2655_v31 = vsel %vm390_vm2, %v2654_v46, %v5902_v32  ;;  %v5938_v43 = vperm.slane %v2643_v33, %v3942_v26  ;;  %v2667_v15 = vsel %vm390_vm2, %v2666_v50, %v5896_v61  ;;  %v2131_v38 = vsel %vm390_vm2, %v2130_v6, %v5373_v17  ;;  %3178 = vrot.lane.b32.xlu0 %v2293_v11, %s3726_s5 }
 0x1ee   : > { %v5941_v7 = vperm.slane %v2655_v31, %v3942_v26  ;;  %v5948_v4 = vperm.slane %v2667_v15, %v3942_v26  ;;  %v2133_v21 = vsel %vm390_vm2, %v5366_v14, %v2132_v24  ;;  %v2137_v45 = vperm.slane %v2131_v38, %v3978_v5 }
 0x1ef   : > { %v2678_v0 = vrot.slane %v5938_v43, 4  ;;  %v2149_v52 = vperm.slane %v5410_v13, %v3978_v5  ;;  %v2141_v62 = vperm.slane %v2133_v21, %v3978_v5  ;;  %v2155_v6 = vsel %vm390_vm2, %v2154_v18, %v5381_v44 }
 0x1f0   : > { %v2702_v58 = vrot.slane %v5948_v4, 4  ;;  %v2168_v46 = vrot.slane %v2125_v8, 4  ;;  %v2161_v14 = vperm.slane %v2155_v6, %v3978_v5  ;;  %v6737_v55 = vrot.slane %v5444_v22, 4 }
 0x1f1   : > { %v2679_v17 = vsel %vm390_vm2, %v2678_v0, %v5927_v53  ;;  %v2166_v24 = vrot.slane %v2149_v52, 4  ;;  %v2176_v60 = vrot.slane %v2137_v45, 4  ;;  %v5992_v38 = vsel %vm390_vm2, %v5444_v22, %v2172_v47 }
 0x1f2   : > { %v5977_v13 = vsel %vm390_vm2, %v6737_v55, %v2129_v49  ;;  %v2685_v50 = vperm.slane %v2679_v17, %v3978_v5  ;;  %v2703_v30 = vsel %vm390_vm2, %v2702_v58, %v5941_v7  ;;  %v5984_v44 = vsel %vm390_vm2, %v2149_v52, %v2168_v46  ;;  %v6748_v55 = vld [vmem:[#allocation45_spill] sm:$0xff] }
 0x1f3   : > { %v2709_v18 = vperm.slane %v2703_v30, %v3978_v5  ;;  %v5988_v33 = vsel %vm390_vm2, %v2166_v24, %v2125_v8  ;;  %v2174_v31 = vrot.slane %v2161_v14, 4  ;;  %v2178_v0 = vrot.slane %v5421_v1, 4 }
 0x1f4   : > { %v2728_v15 = vrot.slane %v2685_v50, 4  ;;  %v2180_v21 = vrot.slane %v2141_v62, 4  ;;  %v5999_v49 = vsel %vm390_vm2, %v2161_v14, %v2176_v60  ;;  %v2966_v8 = vrot.slane %v5977_v13, 4 }
 0x1f5   : > { %v2726_v11 = vrot.slane %v2709_v18, 4  ;;  %v5996_v52 = vsel %vm390_vm2, %v2174_v31, %v2137_v45  ;;  %v6004_v6 = vsel %vm390_vm2, %v2178_v0, %v2141_v62  ;;  %v2978_v46 = vrot.slane %v5992_v38, 4  ;;  %v6738_v0 = vld [vmem:[#allocation38_spill] sm:$0xff] }
 0x1f6   : > { %v2729_v58 = vsel %vm390_vm2, %v2709_v18, %v2728_v15  ;;  %v6008_v22 = vsel %vm390_vm2, %v5421_v1, %v2180_v21  ;;  %v2967_v14 = vsel %vm390_vm2, %v2966_v8, %v5988_v33  ;;  %v2990_v24 = vrot.slane %v6004_v6, 4  ;;  %v6739_v21 = vld [vmem:[#allocation37_spill] sm:$0xff] }
 0x1f7   : > { %3210 = vrot.lane.b32.xlu2 %v2729_v58, %s3724_s3  ;;  %v2727_v45 = vsel %vm390_vm2, %v2726_v11, %v2685_v50  ;;  %v6019_v62 = vperm.slane %v2967_v14, %v3942_v26  ;;  %v2979_v1 = vsel %vm390_vm2, %v2978_v46, %v5984_v44  ;;  %v3002_v30 = vrot.slane %v6008_v22, 4 }
 0x1f8   : > { %3194 = vrot.lane.b32.xlu1 %v2727_v45, %s3725_s4  ;;  %v6026_v47 = vperm.slane %v2979_v1, %v3942_v26  ;;  %v2991_v50 = vsel %vm390_vm2, %v2990_v24, %v5996_v52  ;;  %v2628_v31 = vrot.slane %v5709_v40, 4  ;;  %v6740_v11 = vrot.slane %v6739_v21, 4 }
 0x1f9   : > { %v6033_v60 = vperm.slane %v2991_v50, %v3942_v26  ;;  %v3003_v15 = vsel %vm390_vm2, %v3002_v30, %v5999_v49  ;;  %v6741_v58 = vrot.slane %v6738_v0, 4  ;;  %v6742_v30 = vld [vmem:[#allocation40_spill] sm:$0xff]  ;;  %v6743_v50 = vld [vmem:[#allocation42_spill] sm:$0xff]  ;;  %v1929_v17 = vperm.slane %v6748_v55, %v3978_v5 }
 0x1fa   : > { %v1895_v8 = vsel %vm390_vm2, %v6740_v11, %v6738_v0  ;;  %v6046_v45 = vperm.slane %v3003_v15, %v3942_v26  ;;  %v3014_v40 = vrot.slane %v6026_v47, 4  ;;  %v2629_v14 = vsel %vm390_vm2, %v5697_v39, %v2628_v31 }
 0x1fb   : > { %v1897_v46 = vsel %vm390_vm2, %v6739_v21, %v6741_v58  ;;  %v1901_v24 = vperm.slane %v1895_v8, %v3978_v5  ;;  %3184 = vrot.lane.b32.xlu0 %v2629_v14, %s3726_s5  ;;  %v6744_v0 = vrot.slane %v6743_v50, 4  ;;  %v6745_v21 = vld [vmem:[#allocation39_spill] sm:$0xff]  ;;  %v6750_v50 = vld [vmem:[#allocation44_spill] sm:$0xff] }
 0x1fc   : > { %v1905_v1 = vperm.slane %v1897_v46, %v3978_v5  ;;  %v6746_v58 = vld [vmem:[#allocation43_spill] sm:$0xff]  ;;  %v3015_v39 = vsel %vm390_vm2, %v3014_v40, %v6019_v62  ;;  %v3038_v31 = vrot.slane %v6046_v45, 4 }
 0x1fd   : > { %v1907_v11 = vsel %vm390_vm2, %v6744_v0, %v6742_v30  ;;  %v6747_v15 = vrot.slane %v6746_v58, 4  ;;  %v3021_v14 = vperm.slane %v3015_v39, %v3978_v5  ;;  %v6749_v30 = vld [vmem:[#allocation41_spill] sm:$0xff]  ;;  %v6751_v0 = vrot.slane %v6750_v50, 4 }
 0x1fe   : > { %v1913_v8 = vperm.slane %v1907_v11, %v3978_v5  ;;  %v3039_v55 = vsel %vm390_vm2, %v3038_v31, %v6033_v60  ;;  %v1948_v19 = vrot.slane %v1905_v1, 4 }
 0x1ff   : > { %v1919_v18 = vsel %vm390_vm2, %v6747_v15, %v6745_v21  ;;  %v1931_v58 = vsel %vm390_vm2, %v6751_v0, %v6749_v30  ;;  %v1944_v21 = vrot.slane %v1901_v24, 4  ;;  %v1946_v15 = vrot.slane %v1929_v17, 4 }
 0x200   : > { %v1925_v46 = vperm.slane %v1919_v18, %v3978_v5  ;;  %v1937_v40 = vperm.slane %v1931_v58, %v3978_v5  ;;  %v3045_v11 = vperm.slane %v3039_v55, %v3978_v5  ;;  %v3064_v59 = vrot.slane %v3021_v14, 4  ;;  %v6753_v55 = vld [vmem:[#allocation47_spill] sm:$0xff] }
 0x201   : > { %v6082_v39 = vsel %vm390_vm2, %v1946_v15, %v1905_v1  ;;  %v6088_v50 = vsel %vm390_vm2, %v1929_v17, %v1948_v19  ;;  %v1952_v0 = vrot.slane %v1913_v8, 4  ;;  %v6754_v28 = vrot.slane %v6753_v55, 4  ;;  %v3101_v15 = vpop.permute.xlu2 %3100 }
 0x202   : > { %v1942_v36 = vrot.slane %v1925_v46, 4  ;;  %v6079_v18 = vsel %vm390_vm2, %v1925_v46, %v1944_v21  ;;  %v1950_v31 = vrot.slane %v1937_v40, 4  ;;  %v3065_v58 = vsel %vm390_vm2, %v3045_v11, %v3064_v59 }
 0x203   : > { %v3062_v9 = vrot.slane %v3045_v11, 4  ;;  %v6095_v46 = vsel %vm390_vm2, %v6754_v28, %v6752_v35  ;;  %v1956_v1 = vrot.slane %v6752_v35, 4  ;;  %3216 = vrot.lane.b32.xlu2 %v3065_v58, %s3724_s3  ;;  %v6103_v19 = vsel %vm390_vm2, %v1937_v40, %v1952_v0 }
 0x204   : > { %v6085_v30 = vsel %vm390_vm2, %v1942_v36, %v1901_v24  ;;  %v6100_v36 = vsel %vm390_vm2, %v1950_v31, %v1913_v8  ;;  %v2854_v59 = vrot.slane %v6082_v39, 4  ;;  %v2866_v35 = vrot.slane %v6088_v50, 4 }
 0x205   : > { %v3063_v24 = vsel %vm390_vm2, %v3062_v9, %v3021_v14  ;;  %v6110_v28 = vsel %vm390_vm2, %v6753_v55, %v1956_v1  ;;  %v2878_v40 = vrot.slane %v6095_v46, 4  ;;  %v6122_v14 = vsel %vm3323_vm4, %v5689_v51, %v3101_v15 }
 0x206   : > { %3200 = vrot.lane.b32.xlu1 %v3063_v24, %s3725_s4  ;;  %v2855_v8 = vsel %vm390_vm2, %v2854_v59, %v6085_v30  ;;  %v2890_v11 = vrot.slane %v6110_v28, 4  ;;  %v2867_v0 = vsel %vm390_vm2, %v2866_v35, %v6079_v18  ;;  %v2792_v58 = vrot.slane %v5803_v27, 4 }
 0x207   : > { %v2861_v31 = vperm.slane %v2855_v8, %v3942_v26  ;;  %v2873_v55 = vperm.slane %v2867_v0, %v3942_v26  ;;  %v2879_v1 = vsel %vm390_vm2, %v2878_v40, %v6100_v36  ;;  %v2816_v24 = vrot.slane %v5815_v12, 4 }
 0x208   : > { %v2891_v59 = vsel %vm390_vm2, %v2890_v11, %v6103_v19  ;;  %v2885_v51 = vperm.slane %v2879_v1, %v3942_v26  ;;  %v2793_v35 = vsel %vm390_vm2, %v5806_v23, %v2792_v58  ;;  %v2840_v40 = vrot.slane %v5852_v57, 4 }
 0x209   : > { %v2897_v15 = vperm.slane %v2891_v59, %v3942_v26  ;;  %v2904_v8 = vrot.slane %v2861_v31, 4  ;;  %v2902_v9 = vrot.slane %v2873_v55, 4  ;;  %v2801_v27 = vperm.slane %v2793_v35, %v3978_v5 }
 0x20a   : > { %v2817_v0 = vsel %vm390_vm2, %v5824_v10, %v2816_v24  ;;  %v2928_v21 = vrot.slane %v2885_v51, 4  ;;  %v2841_v58 = vsel %vm390_vm2, %v5865_v54, %v2840_v40  ;;  %v3115_v24 = vpop.permute.xlu2 %3114 }
 0x20b   : > { %v2905_v11 = vsel %vm390_vm2, %v2873_v55, %v2904_v8  ;;  %v2926_v12 = vrot.slane %v2897_v15, 4  ;;  %v2825_v1 = vperm.slane %v2817_v0, %v3978_v5  ;;  %v2903_v17 = vsel %vm390_vm2, %v2902_v9, %v2861_v31 }
 0x20c   : > { %v6145_v59 = vperm.slane %v2905_v11, %v3978_v5  ;;  %v2844_v23 = vrot.slane %v2801_v27, 4  ;;  %v2929_v35 = vsel %vm390_vm2, %v2897_v15, %v2928_v21  ;;  %v2909_v10 = vperm.slane %v2903_v17, %v3978_v5 }
 0x20d   : > { %v2927_v57 = vsel %vm390_vm2, %v2926_v12, %v2885_v51  ;;  %v2842_v55 = vrot.slane %v2825_v1, 4  ;;  %v6154_v8 = vperm.slane %v2929_v35, %v3978_v5  ;;  %v2632_v9 = vrot.slane %v5899_v37, 4 }
 0x20e   : > { %v2933_v0 = vperm.slane %v2927_v57, %v3978_v5  ;;  %v2845_v11 = vsel %vm390_vm2, %v2825_v1, %v2844_v23  ;;  %v6161_v54 = vsel %vm3328_vm5, %v5910_v34, %v3115_v24  ;;  %v2952_v21 = vrot.slane %v2909_v10, 4 }
 0x20f   : > { %v2843_v17 = vsel %vm390_vm2, %v2842_v55, %v2801_v27  ;;  %v2644_v31 = vrot.slane %v5886_v42, 4  ;;  %v2954_v51 = vrot.slane %v6154_v8, 4  ;;  %v2633_v40 = vsel %vm390_vm2, %v5883_v20, %v2632_v9 }
 0x210   : > { %v2950_v15 = vrot.slane %v2933_v0, 4  ;;  %v6755_v12 = vrot.slane %v5902_v32, 4  ;;  %v2953_v1 = vsel %vm390_vm2, %v2933_v0, %v2952_v21  ;;  %v6174_v34 = vperm.slane %v2633_v40, %v3942_v26 }
 0x211   : > { %v2645_v27 = vsel %vm390_vm2, %v5893_v2, %v2644_v31  ;;  %v2955_v23 = vsel %vm390_vm2, %v2954_v51, %v6145_v59  ;;  %3214 = vrot.lane.b32.xlu1 %v2953_v1, %s3724_s3  ;;  %v2680_v57 = vrot.slane %v5927_v53, 4  ;;  %v2704_v55 = vrot.slane %v5941_v7, 4 }
 0x212   : > { %v2657_v37 = vsel %vm390_vm2, %v5905_v56, %v6755_v12  ;;  %v2951_v20 = vsel %vm390_vm2, %v2950_v15, %v2909_v10  ;;  %v6186_v32 = vperm.slane %v2645_v27, %v3942_v26  ;;  %v6756_v56 = vrot.slane %v5896_v61, 4  ;;  %3230 = vrot.lane.b32.xlu2 %v2955_v23, %s3723_s2 }
 0x213   : > { %v6179_v42 = vperm.slane %v2657_v37, %v3942_v26  ;;  %3198 = vrot.lane.b32.xlu0 %v2951_v20, %s3725_s4  ;;  %v2968_v10 = vrot.slane %v5988_v33, 4  ;;  %v2980_v61 = vrot.slane %v5984_v44, 4  ;;  %v6757_v0 = vrot.slane %v5996_v52, 4 }
 0x214   : > { %v2669_v35 = vsel %vm390_vm2, %v5916_v41, %v6756_v56  ;;  %v2690_v24 = vrot.slane %v6186_v32, 4  ;;  %v6758_v9 = vrot.slane %v5999_v49, 4  ;;  %v2681_v7 = vsel %vm390_vm2, %v5938_v43, %v2680_v57 }
 0x215   : > { %v6195_v2 = vperm.slane %v2669_v35, %v3942_v26  ;;  %v2993_v41 = vsel %vm390_vm2, %v6004_v6, %v6757_v0  ;;  %v2705_v33 = vsel %vm390_vm2, %v5948_v4, %v2704_v55  ;;  %v2969_v44 = vsel %vm390_vm2, %v5977_v13, %v2968_v10  ;;  %v6280_v0 = vpop.permute.xlu2 %3120 }
 0x216   : > { %v3005_v21 = vsel %vm390_vm2, %v6008_v22, %v6758_v9  ;;  %v2691_v52 = vsel %vm390_vm2, %v2690_v24, %v6174_v34  ;;  %v2689_v6 = vperm.slane %v2681_v7, %v3978_v5  ;;  %v2713_v49 = vperm.slane %v2705_v33, %v3978_v5 }
 0x217   : > { %v2714_v53 = vrot.slane %v6195_v2, 4  ;;  %v6222_v22 = vperm.slane %v2969_v44, %v3942_v26  ;;  %v6225_v31 = vperm.slane %v2691_v52, %v3978_v5  ;;  %v2981_v4 = vsel %vm390_vm2, %v5992_v38, %v2980_v61 }
 0x218   : > { %v6232_v13 = vperm.slane %v2993_v41, %v3942_v26  ;;  %v2732_v15 = vrot.slane %v2689_v6, 4  ;;  %v2730_v40 = vrot.slane %v2713_v49, 4  ;;  %v6238_v12 = vperm.slane %v2981_v4, %v3942_v26 }
 0x219   : > { %v2715_v43 = vsel %vm390_vm2, %v2714_v53, %v6179_v42  ;;  %v6241_v37 = vperm.slane %v3005_v21, %v3942_v26  ;;  %v3016_v1 = vrot.slane %v6019_v62, 4  ;;  %v3040_v27 = vrot.slane %v6033_v60, 4  ;;  %3228 = vrot.lane.b32.xlu1 %v2843_v17, %s3723_s2 }
 0x21a   : > { %v6235_v51 = vperm.slane %v2715_v43, %v3978_v5  ;;  %v6759_v38 = vrot.slane %v6085_v30, 4  ;;  %v2733_v56 = vsel %vm390_vm2, %v2713_v49, %v2732_v15  ;;  %v2731_v35 = vsel %vm390_vm2, %v2730_v40, %v2689_v6  ;;  %3244 = vrot.lane.b32.xlu2 %v2845_v11, %s3722_s30 }
 0x21b   : > { %v3026_v57 = vrot.slane %v6238_v12, 4  ;;  %3212 = vrot.lane.b32.xlu0 %v2841_v58, %s3724_s3  ;;  %v3050_v62 = vrot.slane %v6241_v37, 4  ;;  %v3017_v60 = vsel %vm390_vm2, %v6026_v47, %v3016_v1  ;;  %v2880_v61 = vrot.slane %v6100_v36, 4 }
 0x21c   : > { %v2857_v23 = vsel %vm390_vm2, %v6082_v39, %v6759_v38  ;;  %v2734_v20 = vrot.slane %v6235_v51, 4  ;;  %v3041_v39 = vsel %vm390_vm2, %v6046_v45, %v3040_v27  ;;  %v3025_v11 = vperm.slane %v3017_v60, %v3978_v5 }
 0x21d   : > { %v6262_v30 = vperm.slane %v2857_v23, %v3942_v26  ;;  %v3027_v55 = vsel %vm390_vm2, %v3026_v57, %v6222_v22  ;;  %v3049_v58 = vperm.slane %v3041_v39, %v3978_v5  ;;  %v3051_v47 = vsel %vm390_vm2, %v3050_v62, %v6232_v13 }
 0x21e   : > { %v2735_v17 = vsel %vm390_vm2, %v2734_v20, %v6225_v31  ;;  %v6271_v10 = vperm.slane %v3027_v55, %v3978_v5  ;;  %v6760_v45 = vrot.slane %v6079_v18, 4  ;;  %v6283_v41 = vperm.slane %v3051_v47, %v3978_v5  ;;  %v6766_v20 = vld [vmem:[#allocation50_spill] sm:$0xff] }
 0x21f   : > { %v3068_v9 = vrot.slane %v3025_v11, 4  ;;  %v3066_v21 = vrot.slane %v3049_v58, 4  ;;  %v2881_v7 = vsel %vm390_vm2, %v6095_v46, %v2880_v61  ;;  %v6761_v18 = vrot.slane %v6103_v19, 4 }
 0x220   : > { %v2869_v24 = vsel %vm390_vm2, %v6088_v50, %v6760_v45  ;;  %v2956_v36 = vrot.slane %v6145_v59, 4  ;;  %v6762_v33 = vrot.slane %v5771_v29, 4  ;;  %v3070_v52 = vrot.slane %v6283_v41, 4 }
 0x221   : > { %v6286_v53 = vperm.slane %v2869_v24, %v3942_v26  ;;  %v2893_v50 = vsel %vm390_vm2, %v6110_v28, %v6761_v18  ;;  %v3069_v6 = vsel %vm390_vm2, %v3049_v58, %v3068_v9  ;;  %v3067_v49 = vsel %vm390_vm2, %v3066_v21, %v3025_v11  ;;  %3242 = vrot.lane.b32.xlu1 %v2733_v56, %s3722_s30  ;;  %v6767_v56 = vld [vmem:[#allocation51_spill] sm:$0xff]  ;;  %v6347_v21 = vpop.permute.xlu2 %3134 }
 0x222   : > { %v2745_v44 = vsel %vm390_vm2, %v5764_v16, %v6762_v33  ;;  %v6303_v46 = vperm.slane %v2881_v7, %v3942_v26  ;;  %v6306_v19 = vperm.slane %v2893_v50, %v3942_v26  ;;  %v6311_v29 = vsel %vm390_vm2, %v6154_v8, %v2956_v36  ;;  %3258 = vrot.lane.b32.xlu2 %v2735_v17, %s3721_s29 }
 0x223   : > { %v2914_v28 = vrot.slane %v6286_v53, 4  ;;  %v2753_v16 = vperm.slane %v2745_v44, %v3942_v26  ;;  %v3071_v59 = vsel %vm390_vm2, %v3070_v52, %v6271_v10  ;;  %v2756_v43 = vrot.slane %v5761_v25, 4  ;;  %3226 = vrot.lane.b32.xlu0 %v2731_v35, %s3723_s2 }
 0x224   : > { %v6763_v4 = vrot.slane %v5787_v63, 4  ;;  %v2780_v40 = vrot.slane %v5774_v3, 4  ;;  %v2938_v1 = vrot.slane %v6306_v19, 4  ;;  %v6764_v63 = vld [vmem:[#allocation34_spill] sm:$0xff]  ;;  %v6768_v57 = vrot.slane %v6767_v56, 4 }
 0x225   : > { %v2915_v8 = vsel %vm390_vm2, %v2914_v28, %v6262_v30  ;;  %v2804_v38 = vrot.slane %v2753_v16, 4  ;;  %v2757_v23 = vsel %vm390_vm2, %v6764_v63, %v2756_v43  ;;  %v2692_v58 = vrot.slane %v6174_v34, 4 }
 0x226   : > { %v2769_v15 = vsel %vm390_vm2, %v5777_v48, %v6763_v4  ;;  %v2921_v25 = vperm.slane %v2915_v8, %v3978_v5  ;;  %v6765_v48 = vld [vmem:[#allocation33_spill] sm:$0xff]  ;;  %v2615_v35 = vsel %vm390_vm2, %v6768_v57, %v6766_v20  ;;  %v2939_v62 = vsel %vm390_vm2, %v2938_v1, %v6303_v46  ;;  %v3105_v1 = vpop.permute.xlu1 %3104 }
 0x227   : > { %v2777_v27 = vperm.slane %v2769_v15, %v3942_v26  ;;  %v2781_v3 = vsel %vm390_vm2, %v6765_v48, %v2780_v40  ;;  %v2765_v60 = vperm.slane %v2757_v23, %v3942_v26  ;;  %v2945_v55 = vperm.slane %v2939_v62, %v3978_v5 }
 0x228   : > { %v2789_v39 = vperm.slane %v2781_v3, %v3942_v26  ;;  %v2960_v11 = vrot.slane %v2921_v25, 4  ;;  %v2716_v47 = vrot.slane %v6179_v42, 4  ;;  %v2693_v42 = vsel %vm390_vm2, %v6186_v32, %v2692_v58 }
 0x229   : > { %v2828_v17 = vrot.slane %v2777_v27, 4  ;;  %v2805_v45 = vsel %vm390_vm2, %v2765_v60, %v2804_v38  ;;  %v2802_v61 = vrot.slane %v2765_v60, 4  ;;  %v2958_v18 = vrot.slane %v2945_v55, 4  ;;  %3248 = vrot.lane.b32.xlu1 %v3069_v6, %s3722_s30  ;;  %v3149_v62 = vpop.permute.xlu2 %3148 }
 0x22a   : > { %v2826_v9 = vrot.slane %v2789_v39, 4  ;;  %v2961_v7 = vsel %vm390_vm2, %v2945_v55, %v2960_v11  ;;  %v2813_v26 = vperm.slane %v2805_v45, %v3978_v5  ;;  %v2717_v33 = vsel %vm390_vm2, %v6195_v2, %v2716_v47  ;;  %3264 = vrot.lane.b32.xlu2 %v3071_v59, %s3721_s29  ;;  %v6769_v45 = vld [vmem:[#allocation16_spill] sm:$0xff] }
 0x22b   : > { %v2829_v24 = vsel %vm390_vm2, %v2789_v39, %v2828_v17  ;;  %v2803_v36 = vsel %vm390_vm2, %v2802_v61, %v2753_v16  ;;  %v2959_v44 = vsel %vm390_vm2, %v2958_v18, %v2921_v25  ;;  %3232 = vrot.lane.b32.xlu0 %v3067_v49, %s3723_s2  ;;  %v2701_v16 = vperm.slane %v2693_v42, %v3978_v5 }
 0x22c   : > { %v2837_v50 = vperm.slane %v2829_v24, %v3978_v5  ;;  %v2827_v34 = vsel %vm390_vm2, %v2826_v9, %v2777_v27  ;;  %v2809_v28 = vperm.slane %v2803_v36, %v3978_v5  ;;  %v2725_v32 = vperm.slane %v2717_v33, %v3978_v5  ;;  %v3089_v27 = vpop.permute.xlu0 %3088 }
 0x22d   : > { %v2833_v43 = vperm.slane %v2827_v34, %v3978_v5  ;;  %v2736_v4 = vrot.slane %v6225_v31, 4  ;;  %v3028_v2 = vrot.slane %v6222_v22, 4  ;;  %v3052_v8 = vrot.slane %v6232_v13, 4 }
 0x22e   : > { %v2850_v52 = vrot.slane %v2837_v50, 4  ;;  %v2848_v15 = vrot.slane %v2809_v28, 4  ;;  %v2740_v38 = vrot.slane %v2701_v16, 4  ;;  %v2738_v59 = vrot.slane %v2725_v32, 4  ;;  %v3119_v58 = vpop.permute.xlu1 %3118 }
 0x22f   : > { %v2846_v40 = vrot.slane %v2833_v43, 4  ;;  %v2737_v49 = vsel %vm390_vm2, %v6235_v51, %v2736_v4  ;;  %v3029_v25 = vsel %vm390_vm2, %v6238_v12, %v3028_v2  ;;  %v3322_v63 = vsel %vm3318_vm3, %v2615_v35, %v3089_v27 }
 0x230   : > { %v2851_v6 = vsel %vm390_vm2, %v2850_v52, %v2813_v26  ;;  %v2849_v31 = vsel %vm390_vm2, %v2833_v43, %v2848_v15  ;;  %v3037_v23 = vperm.slane %v3029_v25, %v3978_v5  ;;  %v3327_v13 = vsel %vm3323_vm4, %v3322_v63, %v3105_v1 }
 0x231   : > { %v2847_v22 = vsel %vm390_vm2, %v2846_v40, %v2809_v28  ;;  %v2741_v48 = vsel %vm390_vm2, %v2725_v32, %v2740_v38  ;;  %v2739_v3 = vsel %vm390_vm2, %v2738_v59, %v2701_v16  ;;  %v3053_v51 = vsel %vm390_vm2, %v6241_v37, %v3052_v8  ;;  %3262 = vrot.lane.b32.xlu1 %v2959_v44, %s3721_s29 }
 0x232   : > { %v3061_v20 = vperm.slane %v3053_v51, %v3978_v5  ;;  %v3076_v12 = vrot.slane %v3037_v23, 4  ;;  %v3072_v56 = vrot.slane %v6271_v10, 4  ;;  %v2916_v57 = vrot.slane %v6262_v30, 4  ;;  %3278 = vrot.lane.b32.xlu2 %v2961_v7, %s3720_s20  ;;  %v3163_v7 = vpop.permute.xlu2 %3162 }
 0x233   : > { %v2940_v35 = vrot.slane %v6303_v46, 4  ;;  %3246 = vrot.lane.b32.xlu0 %v6311_v29, %s3722_s30  ;;  %v2852_v10 = vrot.slane %v2813_v26, 4 }
 0x234   : > { %v3077_v60 = vsel %vm390_vm2, %v3061_v20, %v3076_v12  ;;  %v3074_v39 = vrot.slane %v3061_v20, 4  ;;  %v3073_v17 = vsel %vm390_vm2, %v6283_v41, %v3072_v56  ;;  %v2917_v37 = vsel %vm390_vm2, %v6286_v53, %v2916_v57  ;;  %v3103_v41 = vpop.permute.xlu0 %3102 }
 0x235   : > { %v2941_v30 = vsel %vm390_vm2, %v6306_v19, %v2940_v35  ;;  %v2925_v55 = vperm.slane %v2917_v37, %v3978_v5  ;;  %v2853_v47 = vsel %vm390_vm2, %v2837_v50, %v2852_v10  ;;  %v3326_v29 = vsel %vm3323_vm4, %v6769_v45, %v3103_v41 }
 0x236   : > { %v3075_v46 = vsel %vm390_vm2, %v3074_v39, %v3037_v23  ;;  %v2949_v11 = vperm.slane %v2941_v30, %v3978_v5  ;;  %v3331_v53 = vsel %vm3328_vm5, %v3326_v29, %v3119_v58  ;;  %v3332_v5 = vsel %vm3328_vm5, %v3327_v13, %v6280_v0 }
 0x237   : > { %v2964_v24 = vrot.slane %v2925_v55, 4  ;;  %v3336_v36 = vsel %vm3333_vm6, %v3331_v53, %v6347_v21 }
 0x238   : > { %v2962_v61 = vrot.slane %v2949_v11, 4  ;;  %v3133_v18 = vpop.permute.xlu1 %3132 }
 0x239   : > { %v2965_v19 = vsel %vm390_vm2, %v2949_v11, %v2964_v24  ;;  %3276 = vrot.lane.b32.xlu1 %v2849_v31, %s3720_s20 }
 0x23a   : > { %v2963_v9 = vsel %vm390_vm2, %v2962_v61, %v2925_v55  ;;  %3292 = vrot.lane.b32.xlu2 %v2851_v6, %s3718_s23  ;;  %v3169_v44 = vpop.permute.xlu2 %3168 }
 0x23b   : > { %3260 = vrot.lane.b32.xlu0 %v2847_v22, %s3721_s29 }
 0x23c   : > { %v3117_v26 = vpop.permute.xlu0 %3116 }
 0x23d   : > { %v3330_v50 = vsel %vm3328_vm5, %v6122_v14, %v3117_v26 }
 0x23e   : > { %v3335_v34 = vsel %vm3333_vm6, %v3330_v50, %v3133_v18 }
 0x23f   : > { %v3340_v28 = vsel %vm3338_vm7, %v3335_v34, %v3149_v62 }
 0x240   : > { %v3147_v42 = vpop.permute.xlu1 %3146 }
 0x241   : > { %3290 = vrot.lane.b32.xlu1 %v2739_v3, %s3718_s23 }
 0x242   : > { %3306 = vrot.lane.b32.xlu2 %v2741_v48, %s3719_s28  ;;  %v3183_v32 = vpop.permute.xlu2 %3182 }
 0x243   : > { %3274 = vrot.lane.b32.xlu0 %v2737_v49, %s3720_s20 }
 0x244   : > { %v3131_v33 = vpop.permute.xlu0 %3130 }
 0x245   : > { %v3334_v0 = vsel %vm3333_vm6, %v6161_v54, %v3131_v33 }
 0x246   : > { %v3339_v14 = vsel %vm3338_vm7, %v3334_v0, %v3147_v42 }
 0x247   : > { %v3344_v2 = vsel %vm3343_vm8, %v3339_v14, %v3163_v7 }
 0x248   : > { %v3153_v21 = vpop.permute.xlu1 %3152 }
 0x249   : > { %3296 = vrot.lane.b32.xlu1 %v3075_v46, %s3718_s23 }
 0x24a   : > { %3312 = vrot.lane.b32.xlu2 %v3077_v60, %s3719_s28  ;;  %v3197_v40 = vpop.permute.xlu2 %3196 }
 0x24b   : > { %3280 = vrot.lane.b32.xlu0 %v3073_v17, %s3720_s20 }
 0x24c   : > { %v3137_v52 = vpop.permute.xlu0 %3136 }
 0x24d   : > { %v3337_v43 = vsel %vm3333_vm6, %v3332_v5, %v3137_v52 }
 0x24e   : > { %v3342_v16 = vsel %vm3338_vm7, %v3337_v43, %v3153_v21 }
 0x24f   : > { %v3347_v27 = vsel %vm3343_vm8, %v3342_v16, %v3169_v44 }
 0x250   : > { %v3167_v54 = vpop.permute.xlu1 %3166 }
 0x251   : > { %3310 = vrot.lane.b32.xlu1 %v2965_v19, %s3719_s28 }
 0x252   : > { %v3211_v49 = vpop.permute.xlu2 %3210 }
 0x253   : > { %3294 = vrot.lane.b32.xlu0 %v2963_v9, %s3718_s23  ;;  %s6458_s23 = scalar_lea.vmem %s6515_s1, %s3522_s27 }
 0x254   : > { %v3151_v4 = vpop.permute.xlu0 %3150 }
 0x255   : > { %v3341_v6 = vsel %vm3338_vm7, %v3336_v36, %v3151_v4 }
 0x256   : > { %v3346_v15 = vsel %vm3343_vm8, %v3341_v6, %v3167_v54 }
 0x257   : > { %v3351_v25 = vsel %vm3348_vm9, %v3346_v15, %v3183_v32 }
 0x258   : > { %v3181_v8 = vpop.permute.xlu1 %3180 }
 0x25b   : > { %3308 = vrot.lane.b32.xlu0 %v2853_v47, %s3719_s28 }
 0x25c   : > { %v3165_v1 = vpop.permute.xlu0 %3164 }
 0x25d   : > { %v3345_v38 = vsel %vm3343_vm8, %v3340_v28, %v3165_v1  ;;  %v3217_v22 = vpop.permute.xlu2 %3216 }
 0x25e   : > { %v3350_v59 = vsel %vm3348_vm9, %v3345_v38, %v3181_v8 }
 0x25f   : > { %v6436_v31 = vsel %vm3353_vm10, %v3350_v59, %v3197_v40 }
 0x264   : > { %v3179_v23 = vpop.permute.xlu0 %3178 }
 0x265   : > { %v3349_v55 = vsel %vm3348_vm9, %v3344_v2, %v3179_v23 }
 0x26a   : > { %v3195_v63 = vpop.permute.xlu1 %3194 }
 0x26b   : > { %v3354_v11 = vsel %vm3353_vm10, %v3349_v55, %v3195_v63 }
 0x26c   : > { %v3231_v13 = vpop.permute.xlu2 %3230  ;;  %v3359_v45 = vsel %vm3358_vm11, %v3354_v11, %v3211_v49 }
 0x26d   : > { %v3185_v3 = vpop.permute.xlu0 %3184 }
 0x26e   : > { %v3352_v24 = vsel %vm3348_vm9, %v3347_v27, %v3185_v3 }
 0x274   : > { %v6438_v51 = vpop.permute.xlu2 %3244 }
 0x278   : > { %v3201_v48 = vpop.permute.xlu1 %3200 }
 0x279   : > { %v3357_v53 = vsel %vm3353_vm10, %v3352_v24, %v3201_v48 }
 0x27a   : > { %v3362_v18 = vsel %vm3358_vm11, %v3357_v53, %v3217_v22 }
 0x27c   : > { %v3259_v57 = vpop.permute.xlu2 %3258 }
 0x283   : > { %v3215_v20 = vpop.permute.xlu1 %3214 }
 0x284   : > { %v3265_v39 = vpop.permute.xlu2 %3264 }
 0x285   : > { %v3199_v12 = vpop.permute.xlu0 %3198 }
 0x286   : > { %v3356_v34 = vsel %vm3353_vm10, %v3351_v25, %v3199_v12 }
 0x287   : > { %v3361_v0 = vsel %vm3358_vm11, %v3356_v34, %v3215_v20 }
 0x288   : > { %v3366_v52 = vsel %vm3363_vm12, %v3361_v0, %v3231_v13 }
 0x28b   : > { %v6440_v56 = vpop.permute.xlu1 %3228 }
 0x28c   : > { %v3279_v30 = vpop.permute.xlu2 %3278 }
 0x28d   : > { %v3213_v35 = vpop.permute.xlu0 %3212 }
 0x28e   : > { %v3360_v54 = vsel %vm3358_vm11, %v6436_v31, %v3213_v35 }
 0x28f   : > { %v3365_v6 = vsel %vm3363_vm12, %v3360_v54, %v6440_v56 }
 0x290   : > { %v3370_v1 = vsel %vm3368_vm13, %v3365_v6, %v6438_v51 }
 0x293   : > { %v3243_v62 = vpop.permute.xlu1 %3242 }
 0x294   : > { %v3293_v58 = vpop.permute.xlu2 %3292 }
 0x295   : > { %v3227_v60 = vpop.permute.xlu0 %3226 }
 0x296   : > { %v3364_v29 = vsel %vm3363_vm12, %v3359_v45, %v3227_v60 }
 0x297   : > { %v3369_v61 = vsel %vm3368_vm13, %v3364_v29, %v3243_v62 }
 0x298   : > { %v3374_v7 = vsel %vm3373_vm14, %v3369_v61, %v3259_v57 }
 0x29b   : > { %v3249_v17 = vpop.permute.xlu1 %3248 }
 0x29c   : > { %v3307_v9 = vpop.permute.xlu2 %3306 }
 0x29d   : > { %v3233_v37 = vpop.permute.xlu0 %3232 }
 0x29e   : > { %v3367_v50 = vsel %vm3363_vm12, %v3362_v18, %v3233_v37 }
 0x29f   : > { %v3372_v33 = vsel %vm3368_vm13, %v3367_v50, %v3249_v17 }
 0x2a0   : > { %v3377_v14 = vsel %vm3373_vm14, %v3372_v33, %v3265_v39 }
 0x2a3   : > { %v3263_v10 = vpop.permute.xlu1 %3262 }
 0x2a4   : > { %v3313_v43 = vpop.permute.xlu2 %3312 }
 0x2a5   : > { %v3247_v46 = vpop.permute.xlu0 %3246 }
 0x2a6   : > { %v3371_v16 = vsel %vm3368_vm13, %v3366_v52, %v3247_v46 }
 0x2a7   : > { %v3376_v2 = vsel %vm3373_vm14, %v3371_v16, %v3263_v10 }
 0x2a8   : > { %v3381_v40 = vsel %vm3378_vm15, %v3376_v2, %v3279_v30 }
 0x2ab   : > { %v3277_v41 = vpop.permute.xlu1 %3276 }
 0x2ad   : > { %v3261_v47 = vpop.permute.xlu0 %3260 }
 0x2ae   : > { %v3375_v38 = vsel %vm3373_vm14, %v3370_v1, %v3261_v47 }
 0x2af   : > { %v3380_v49 = vsel %vm3378_vm15, %v3375_v38, %v3277_v41 }
 0x2b0   : > { %v3385_v25 = vsel %vm3383_vm1, %v3380_v49, %v3293_v58 }
 0x2b3   : > { %v3291_v19 = vpop.permute.xlu1 %3290 }
 0x2b5   : > { %v3275_v5 = vpop.permute.xlu0 %3274 }
 0x2b6   : > { %v3379_v26 = vsel %vm3378_vm15, %v3374_v7, %v3275_v5 }
 0x2b7   : > { %v3384_v36 = vsel %vm3383_vm1, %v3379_v26, %v3291_v19 }
 0x2b8   : > { %v3389_v42 = vsel %vm3388_vm0, %v3384_v36, %v3307_v9 }
 0x2b9   : > { %3393 = vst [vmem:[%s6458_s23] sm:$0xff] %v3389_v42 }
 0x2bb   : > { %v3297_v44 = vpop.permute.xlu1 %3296 }
 0x2bd   : > { %v3281_v21 = vpop.permute.xlu0 %3280 }
 0x2be   : > { %v3382_v28 = vsel %vm3378_vm15, %v3377_v14, %v3281_v21 }
 0x2bf   : > { %v3387_v32 = vsel %vm3383_vm1, %v3382_v28, %v3297_v44 }
 0x2c0   : > { %v3392_v4 = vsel %vm3388_vm0, %v3387_v32, %v3313_v43 }
 0x2c1   : > { %3396 = vst [vmem:[%s6458_s23 + $0x18] sm:$0xff] %v3392_v4 }
 0x2c3   : > { %v3311_v15 = vpop.permute.xlu1 %3310 }
 0x2c5   : > { %v3295_v8 = vpop.permute.xlu0 %3294 }
 0x2c6   : > { %v3386_v27 = vsel %vm3383_vm1, %v3381_v40, %v3295_v8 }
 0x2c7   : > { %v3391_v59 = vsel %vm3388_vm0, %v3386_v27, %v3311_v15 }
 0x2c8   : > { %3395 = vst [vmem:[%s6458_s23 + $0x10] sm:$0xff] %v3391_v59 }
 0x2cd   : > { %v3309_v31 = vpop.permute.xlu0 %3308 }
 0x2ce   : > { %v3390_v22 = vsel %vm3388_vm0, %v3385_v25, %v3309_v31 }
 0x2cf   : > { %3394 = vst [vmem:[%s6458_s23 + $0x8] sm:$0xff] %v3390_v22 }
 0x2d0 PF: > { %s14_s13 = sadd.s32 1, %s3713_s13   ;;  %s6770_s6 = smov %s3689_s7 }
 0x2d1   : > { %p11_p2 = scmp.ge.s32.totalorder %s14_s13, 10   ;;  %s6771_s7 = smov %s3693_s8 }
 0x2d2   : > { %s6772_s8 = smov %s3812_s26  ;;  %s6773_s9 = smov %s3705_s11 }
 0x2d3   : > { %s6774_s10 = smov %s3709_s12  ;;  %s6775_s11 = smov %s6778_s15 }
 0x2d4   : > { %s6776_s12 = smov %s6782_s16  ;;  %13 = sbr.rel (!%p11_p2) target bundleno = 5 (0x5), region = 64 }
 0x2d9   :  { %3433 = vsyncpa [#allocation3], 1 }
 0x2da   :  { %3435 = vsyncpa [#allocation3 + $0x1], 1 }

</bundles_post_ra>
